<compile_context>
chip_gen: v7x
topology: tpu7x:2x2x1
jax: 0.10.0
libtpu: 0.0.40
codegen_flags: <defaults>
</compile_context>

<pallas_src>
import functools
import math

import jax
import jax.numpy as jnp
from jax.experimental import pallas as pl
from jax.experimental.pallas import tpu as pltpu


# ---------------------------------------------------------------------------
# Fused kernel: num_layers x LSTM + (Linear -> ReLU -> Linear -> Sigmoid)
# Gate order follows PyTorch nn.LSTM: i, f, g, o.
# ---------------------------------------------------------------------------
def _fused_lstm_fc_kernel(*refs, num_layers, hidden, seq_len, in_size):
    """refs = (x_ref,                                  # (B, T*D) batch-first, time on lanes
               [w_ih_t, w_hh_t, bias] * num_layers,    # (D_in,4H), (H,4H), (1,4H)
               w1_t, b1, w2_t, b2,                     # FC head weights
               o_ref)                                  # (B, out)
    """
    x_ref = refs[0]
    lstm_refs = refs[1:1 + 3 * num_layers]
    w1_ref, b1_ref, w2_ref, b2_ref, o_ref = refs[1 + 3 * num_layers:]

    B = x_ref.shape[0]
    T, H, D = seq_len, hidden, in_size

    x = x_ref[...]                                   # (B, T*D), VMEM resident

    h_seq = None                                     # list of per-step (B, H) hidden states
    for layer in range(num_layers):
        w_ih = lstm_refs[3 * layer][...]             # (D_in, 4H)
        w_hh = lstm_refs[3 * layer + 1][...]         # (H, 4H)
        bias = lstm_refs[3 * layer + 2][...]         # (1, 4H)

        # Hoist the time-independent input projection off the serial recurrence.
        if layer == 0:
            gx = [jnp.dot(x[:, t * D:(t + 1) * D], w_ih,
                          preferred_element_type=jnp.float32) + bias
                  for t in range(T)]
        else:
            gx = [jnp.dot(h_seq[t], w_ih,
                          preferred_element_type=jnp.float32) + bias
                  for t in range(T)]

        h = jnp.zeros((B, H), jnp.float32)
        c = jnp.zeros((B, H), jnp.float32)
        h_seq = []
        # T is small and static -> full unroll exposes the whole dataflow to the
        # scheduler; only the h @ W_hh matmul chains serially across steps.
        for t in range(T):
            gates = gx[t] + jnp.dot(h, w_hh, preferred_element_type=jnp.float32)  # (B, 4H)
            # Full 128-lane activations (2 EUP ops), then static lane slices.
            sig = jax.nn.sigmoid(gates)
            tah = jnp.tanh(gates)
            i_g = sig[:, 0 * H:1 * H]
            f_g = sig[:, 1 * H:2 * H]
            g_g = tah[:, 2 * H:3 * H]
            o_g = sig[:, 3 * H:4 * H]
            c = f_g * c + i_g * g_g
            h = o_g * jnp.tanh(c)
            h_seq.append(h)
        # TODO(synk): nn.LSTM inter-layer dropout (p=0.2) is identity in eval mode.

    # FC head on the last timestep of the last layer.
    last = h_seq[-1]                                                   # (B, H)
    z = jnp.dot(last, w1_ref[...], preferred_element_type=jnp.float32) + b1_ref[...]
    z = jnp.maximum(z, 0.0)
    # TODO(synk): fc Dropout(0.2) is identity in eval mode.
    y = jnp.dot(z, w2_ref[...], preferred_element_type=jnp.float32) + b2_ref[...]
    o_ref[...] = jax.nn.sigmoid(y).astype(o_ref.dtype)


def eel_health_lstm_forward(params, x):
    """x: (B, T, input_size) batch_first, like the PyTorch module. Returns (B, output_size)."""
    B, T, D = x.shape
    H = params["lstm"][0]["w_hh_t"].shape[0]
    num_layers = len(params["lstm"])
    out_dim = params["w2_t"].shape[1]

    # Free contiguous reshape (NO transpose): timestep t lives at lanes [t*D, (t+1)*D).
    x2 = x.reshape(B, T * D).astype(jnp.float32)

    args = [x2]
    for layer in params["lstm"]:
        args += [layer["w_ih_t"], layer["w_hh_t"], layer["bias"]]
    args += [params["w1_t"], params["b1"], params["w2_t"], params["b2"]]

    kernel = functools.partial(_fused_lstm_fc_kernel,
                               num_layers=num_layers, hidden=H, seq_len=T, in_size=D)
    vmem = pl.BlockSpec(memory_space=pltpu.MemorySpace.VMEM)
    return pl.pallas_call(
        kernel,
        out_shape=jax.ShapeDtypeStruct((B, out_dim), jnp.float32),
        in_specs=[vmem] * len(args),
        out_specs=vmem,
    )(*args)


# ---------------------------------------------------------------------------
# Parameter init (deterministic, PyTorch-style uniform(-1/sqrt(H), 1/sqrt(H)))
# ---------------------------------------------------------------------------
def init_params(key, input_size, hidden_size, num_layers, output_size):
    bound = 1.0 / math.sqrt(hidden_size)
    params = {"lstm": []}
    for layer in range(num_layers):
        d_in = input_size if layer == 0 else hidden_size
        key, k1, k2, k3, k4 = jax.random.split(key, 5)
        w_ih = jax.random.uniform(k1, (4 * hidden_size, d_in), jnp.float32, -bound, bound)
        w_hh = jax.random.uniform(k2, (4 * hidden_size, hidden_size), jnp.float32, -bound, bound)
        b_ih = jax.random.uniform(k3, (4 * hidden_size,), jnp.float32, -bound, bound)
        b_hh = jax.random.uniform(k4, (4 * hidden_size,), jnp.float32, -bound, bound)
        params["lstm"].append({
            "w_ih_t": w_ih.T,                       # (D_in, 4H)
            "w_hh_t": w_hh.T,                       # (H, 4H)
            "bias": (b_ih + b_hh)[None, :],         # (1, 4H)
        })
    half = hidden_size // 2
    key, k1, k2, k3, k4 = jax.random.split(key, 5)
    b1f = 1.0 / math.sqrt(hidden_size)
    b2f = 1.0 / math.sqrt(half)
    params["w1_t"] = jax.random.uniform(k1, (hidden_size, half), jnp.float32, -b1f, b1f)
    params["b1"] = jax.random.uniform(k2, (1, half), jnp.float32, -b1f, b1f)
    params["w2_t"] = jax.random.uniform(k3, (half, output_size), jnp.float32, -b2f, b2f)
    params["b2"] = jax.random.uniform(k4, (1, output_size), jnp.float32, -b2f, b2f)
    return params


# ---------------------------------------------------------------------------
# Pure-JAX reference (for correctness check)
# ---------------------------------------------------------------------------
def _ref_forward(params, x):
    h_seq = jnp.transpose(x, (1, 0, 2)).astype(jnp.float32)
    for layer in params["lstm"]:
        H = layer["w_hh_t"].shape[0]
        B = h_seq.shape[1]
        h = jnp.zeros((B, H), jnp.float32)
        c = jnp.zeros((B, H), jnp.float32)
        outs = []
        for t in range(h_seq.shape[0]):
            gates = h_seq[t] @ layer["w_ih_t"] + h @ layer["w_hh_t"] + layer["bias"]
            i = jax.nn.sigmoid(gates[:, 0 * H:1 * H])
            f = jax.nn.sigmoid(gates[:, 1 * H:2 * H])
            g = jnp.tanh(gates[:, 2 * H:3 * H])
            o = jax.nn.sigmoid(gates[:, 3 * H:4 * H])
            c = f * c + i * g
            h = o * jnp.tanh(c)
            outs.append(h)
        h_seq = jnp.stack(outs, axis=0)
    last = h_seq[-1]
    z = jnp.maximum(last @ params["w1_t"] + params["b1"], 0.0)
    return jax.nn.sigmoid(z @ params["w2_t"] + params["b2"])


if __name__ == "__main__":
    input_size, hidden_size, num_layers, output_size = 4, 32, 2, 1
    batch, seq = 2, 8

    key = jax.random.PRNGKey(0)
    key, pkey, xkey = jax.random.split(key, 3)
    params = init_params(pkey, input_size, hidden_size, num_layers, output_size)
    x = jax.random.normal(xkey, (batch, seq, input_size), jnp.float32)

    fwd = jax.jit(eel_health_lstm_forward)
    out = jax.block_until_ready(fwd(params, x))

    ref = _ref_forward(params, x)
    assert out.shape == (batch, output_size)
    assert jnp.allclose(out, ref, rtol=1e-5, atol=1e-5), (out, ref)

    print("KERNEL_OK")
</pallas_src>

<mosaic_0001>
module attributes {stable_mosaic.version = 11 : i64} {
  func.func @_fused_lstm_fc_kernel(%arg0: memref<2x32xf32, #tpu.memory_space<vmem>>, %arg1: memref<4x128xf32, #tpu.memory_space<vmem>>, %arg2: memref<32x128xf32, #tpu.memory_space<vmem>>, %arg3: memref<1x128xf32, #tpu.memory_space<vmem>>, %arg4: memref<32x128xf32, #tpu.memory_space<vmem>>, %arg5: memref<32x128xf32, #tpu.memory_space<vmem>>, %arg6: memref<1x128xf32, #tpu.memory_space<vmem>>, %arg7: memref<32x16xf32, #tpu.memory_space<vmem>>, %arg8: memref<1x16xf32, #tpu.memory_space<vmem>>, %arg9: memref<16x1xf32, #tpu.memory_space<vmem>>, %arg10: memref<1x1xf32, #tpu.memory_space<vmem>>, %arg11: memref<2x1xf32, #tpu.memory_space<vmem>>) attributes {dimension_semantics = [], scalar_prefetch = 0 : i64, scratch_operands = 0 : i64, tpu.core_type = #tpu.core_type<tc>} {
    %c0 = arith.constant 0 : index
    %c0_0 = arith.constant 0 : index
    %0 = vector.load %arg0[%c0, %c0_0] : memref<2x32xf32, #tpu.memory_space<vmem>>, vector<2x32xf32>
    %c0_1 = arith.constant 0 : index
    %c0_2 = arith.constant 0 : index
    %1 = vector.load %arg1[%c0_1, %c0_2] : memref<4x128xf32, #tpu.memory_space<vmem>>, vector<4x128xf32>
    %c0_3 = arith.constant 0 : index
    %c0_4 = arith.constant 0 : index
    %2 = vector.load %arg2[%c0_3, %c0_4] : memref<32x128xf32, #tpu.memory_space<vmem>>, vector<32x128xf32>
    %c0_5 = arith.constant 0 : index
    %c0_6 = arith.constant 0 : index
    %3 = vector.load %arg3[%c0_5, %c0_6] : memref<1x128xf32, #tpu.memory_space<vmem>>, vector<1x128xf32>
    %4 = vector.extract_strided_slice %0 {offsets = [0, 0], sizes = [2, 4], strides = [1, 1]} : vector<2x32xf32> to vector<2x4xf32>
    %cst = arith.constant dense<0.000000e+00> : vector<2x128xf32>
    %5 = tpu.matmul %4, %1, %cst {dimension_numbers = #tpu.dot_dimension_numbers<[1], [0], [0], [1], [0, 0, 1, 1], [], []>} : vector<2x4xf32>, vector<4x128xf32>, vector<2x128xf32> -> vector<2x128xf32>
    %6 = vector.broadcast %3 : vector<1x128xf32> to vector<2x128xf32>
    %7 = arith.addf %5, %6 : vector<2x128xf32>
    %8 = vector.extract_strided_slice %0 {offsets = [0, 4], sizes = [2, 4], strides = [1, 1]} : vector<2x32xf32> to vector<2x4xf32>
    %cst_7 = arith.constant dense<0.000000e+00> : vector<2x128xf32>
    %9 = tpu.matmul %8, %1, %cst_7 {dimension_numbers = #tpu.dot_dimension_numbers<[1], [0], [0], [1], [0, 0, 1, 1], [], []>} : vector<2x4xf32>, vector<4x128xf32>, vector<2x128xf32> -> vector<2x128xf32>
    %10 = vector.broadcast %3 : vector<1x128xf32> to vector<2x128xf32>
    %11 = arith.addf %9, %10 : vector<2x128xf32>
    %12 = vector.extract_strided_slice %0 {offsets = [0, 8], sizes = [2, 4], strides = [1, 1]} : vector<2x32xf32> to vector<2x4xf32>
    %cst_8 = arith.constant dense<0.000000e+00> : vector<2x128xf32>
    %13 = tpu.matmul %12, %1, %cst_8 {dimension_numbers = #tpu.dot_dimension_numbers<[1], [0], [0], [1], [0, 0, 1, 1], [], []>} : vector<2x4xf32>, vector<4x128xf32>, vector<2x128xf32> -> vector<2x128xf32>
    %14 = vector.broadcast %3 : vector<1x128xf32> to vector<2x128xf32>
    %15 = arith.addf %13, %14 : vector<2x128xf32>
    %16 = vector.extract_strided_slice %0 {offsets = [0, 12], sizes = [2, 4], strides = [1, 1]} : vector<2x32xf32> to vector<2x4xf32>
    %cst_9 = arith.constant dense<0.000000e+00> : vector<2x128xf32>
    %17 = tpu.matmul %16, %1, %cst_9 {dimension_numbers = #tpu.dot_dimension_numbers<[1], [0], [0], [1], [0, 0, 1, 1], [], []>} : vector<2x4xf32>, vector<4x128xf32>, vector<2x128xf32> -> vector<2x128xf32>
    %18 = vector.broadcast %3 : vector<1x128xf32> to vector<2x128xf32>
    %19 = arith.addf %17, %18 : vector<2x128xf32>
    %20 = vector.extract_strided_slice %0 {offsets = [0, 16], sizes = [2, 4], strides = [1, 1]} : vector<2x32xf32> to vector<2x4xf32>
    %cst_10 = arith.constant dense<0.000000e+00> : vector<2x128xf32>
    %21 = tpu.matmul %20, %1, %cst_10 {dimension_numbers = #tpu.dot_dimension_numbers<[1], [0], [0], [1], [0, 0, 1, 1], [], []>} : vector<2x4xf32>, vector<4x128xf32>, vector<2x128xf32> -> vector<2x128xf32>
    %22 = vector.broadcast %3 : vector<1x128xf32> to vector<2x128xf32>
    %23 = arith.addf %21, %22 : vector<2x128xf32>
    %24 = vector.extract_strided_slice %0 {offsets = [0, 20], sizes = [2, 4], strides = [1, 1]} : vector<2x32xf32> to vector<2x4xf32>
    %cst_11 = arith.constant dense<0.000000e+00> : vector<2x128xf32>
    %25 = tpu.matmul %24, %1, %cst_11 {dimension_numbers = #tpu.dot_dimension_numbers<[1], [0], [0], [1], [0, 0, 1, 1], [], []>} : vector<2x4xf32>, vector<4x128xf32>, vector<2x128xf32> -> vector<2x128xf32>
    %26 = vector.broadcast %3 : vector<1x128xf32> to vector<2x128xf32>
    %27 = arith.addf %25, %26 : vector<2x128xf32>
    %28 = vector.extract_strided_slice %0 {offsets = [0, 24], sizes = [2, 4], strides = [1, 1]} : vector<2x32xf32> to vector<2x4xf32>
    %cst_12 = arith.constant dense<0.000000e+00> : vector<2x128xf32>
    %29 = tpu.matmul %28, %1, %cst_12 {dimension_numbers = #tpu.dot_dimension_numbers<[1], [0], [0], [1], [0, 0, 1, 1], [], []>} : vector<2x4xf32>, vector<4x128xf32>, vector<2x128xf32> -> vector<2x128xf32>
    %30 = vector.broadcast %3 : vector<1x128xf32> to vector<2x128xf32>
    %31 = arith.addf %29, %30 : vector<2x128xf32>
    %32 = vector.extract_strided_slice %0 {offsets = [0, 28], sizes = [2, 4], strides = [1, 1]} : vector<2x32xf32> to vector<2x4xf32>
    %cst_13 = arith.constant dense<0.000000e+00> : vector<2x128xf32>
    %33 = tpu.matmul %32, %1, %cst_13 {dimension_numbers = #tpu.dot_dimension_numbers<[1], [0], [0], [1], [0, 0, 1, 1], [], []>} : vector<2x4xf32>, vector<4x128xf32>, vector<2x128xf32> -> vector<2x128xf32>
    %34 = vector.broadcast %3 : vector<1x128xf32> to vector<2x128xf32>
    %35 = arith.addf %33, %34 : vector<2x128xf32>
    %cst_14 = arith.constant 0.000000e+00 : f32
    %36 = vector.broadcast %cst_14 : f32 to vector<2x32xf32>
    %cst_15 = arith.constant 0.000000e+00 : f32
    %37 = vector.broadcast %cst_15 : f32 to vector<2x32xf32>
    %cst_16 = arith.constant dense<0.000000e+00> : vector<2x128xf32>
    %38 = tpu.matmul %36, %2, %cst_16 {dimension_numbers = #tpu.dot_dimension_numbers<[1], [0], [0], [1], [0, 0, 1, 1], [], []>} : vector<2x32xf32>, vector<32x128xf32>, vector<2x128xf32> -> vector<2x128xf32>
    %39 = arith.addf %7, %38 : vector<2x128xf32>
    %40 = arith.negf %39 : vector<2x128xf32>
    %41 = math.exp %40 : vector<2x128xf32>
    %cst_17 = arith.constant 1.000000e+00 : f32
    %42 = vector.broadcast %cst_17 : f32 to vector<2x128xf32>
    %43 = arith.addf %42, %41 : vector<2x128xf32>
    %44 = arith.divf %42, %43 : vector<2x128xf32>
    %45 = math.tanh %39 : vector<2x128xf32>
    %46 = vector.extract_strided_slice %44 {offsets = [0, 0], sizes = [2, 32], strides = [1, 1]} : vector<2x128xf32> to vector<2x32xf32>
    %47 = vector.extract_strided_slice %44 {offsets = [0, 32], sizes = [2, 32], strides = [1, 1]} : vector<2x128xf32> to vector<2x32xf32>
    %48 = vector.extract_strided_slice %45 {offsets = [0, 64], sizes = [2, 32], strides = [1, 1]} : vector<2x128xf32> to vector<2x32xf32>
    %49 = vector.extract_strided_slice %44 {offsets = [0, 96], sizes = [2, 32], strides = [1, 1]} : vector<2x128xf32> to vector<2x32xf32>
    %50 = arith.mulf %47, %37 : vector<2x32xf32>
    %51 = arith.mulf %46, %48 : vector<2x32xf32>
    %52 = arith.addf %50, %51 : vector<2x32xf32>
    %53 = math.tanh %52 : vector<2x32xf32>
    %54 = arith.mulf %49, %53 : vector<2x32xf32>
    %cst_18 = arith.constant dense<0.000000e+00> : vector<2x128xf32>
    %55 = tpu.matmul %54, %2, %cst_18 {dimension_numbers = #tpu.dot_dimension_numbers<[1], [0], [0], [1], [0, 0, 1, 1], [], []>} : vector<2x32xf32>, vector<32x128xf32>, vector<2x128xf32> -> vector<2x128xf32>
    %56 = arith.addf %11, %55 : vector<2x128xf32>
    %57 = arith.negf %56 : vector<2x128xf32>
    %58 = math.exp %57 : vector<2x128xf32>
    %cst_19 = arith.constant 1.000000e+00 : f32
    %59 = vector.broadcast %cst_19 : f32 to vector<2x128xf32>
    %60 = arith.addf %59, %58 : vector<2x128xf32>
    %61 = arith.divf %59, %60 : vector<2x128xf32>
    %62 = math.tanh %56 : vector<2x128xf32>
    %63 = vector.extract_strided_slice %61 {offsets = [0, 0], sizes = [2, 32], strides = [1, 1]} : vector<2x128xf32> to vector<2x32xf32>
    %64 = vector.extract_strided_slice %61 {offsets = [0, 32], sizes = [2, 32], strides = [1, 1]} : vector<2x128xf32> to vector<2x32xf32>
    %65 = vector.extract_strided_slice %62 {offsets = [0, 64], sizes = [2, 32], strides = [1, 1]} : vector<2x128xf32> to vector<2x32xf32>
    %66 = vector.extract_strided_slice %61 {offsets = [0, 96], sizes = [2, 32], strides = [1, 1]} : vector<2x128xf32> to vector<2x32xf32>
    %67 = arith.mulf %64, %52 : vector<2x32xf32>
    %68 = arith.mulf %63, %65 : vector<2x32xf32>
    %69 = arith.addf %67, %68 : vector<2x32xf32>
    %70 = math.tanh %69 : vector<2x32xf32>
    %71 = arith.mulf %66, %70 : vector<2x32xf32>
    %cst_20 = arith.constant dense<0.000000e+00> : vector<2x128xf32>
    %72 = tpu.matmul %71, %2, %cst_20 {dimension_numbers = #tpu.dot_dimension_numbers<[1], [0], [0], [1], [0, 0, 1, 1], [], []>} : vector<2x32xf32>, vector<32x128xf32>, vector<2x128xf32> -> vector<2x128xf32>
    %73 = arith.addf %15, %72 : vector<2x128xf32>
    %74 = arith.negf %73 : vector<2x128xf32>
    %75 = math.exp %74 : vector<2x128xf32>
    %cst_21 = arith.constant 1.000000e+00 : f32
    %76 = vector.broadcast %cst_21 : f32 to vector<2x128xf32>
    %77 = arith.addf %76, %75 : vector<2x128xf32>
    %78 = arith.divf %76, %77 : vector<2x128xf32>
    %79 = math.tanh %73 : vector<2x128xf32>
    %80 = vector.extract_strided_slice %78 {offsets = [0, 0], sizes = [2, 32], strides = [1, 1]} : vector<2x128xf32> to vector<2x32xf32>
    %81 = vector.extract_strided_slice %78 {offsets = [0, 32], sizes = [2, 32], strides = [1, 1]} : vector<2x128xf32> to vector<2x32xf32>
    %82 = vector.extract_strided_slice %79 {offsets = [0, 64], sizes = [2, 32], strides = [1, 1]} : vector<2x128xf32> to vector<2x32xf32>
    %83 = vector.extract_strided_slice %78 {offsets = [0, 96], sizes = [2, 32], strides = [1, 1]} : vector<2x128xf32> to vector<2x32xf32>
    %84 = arith.mulf %81, %69 : vector<2x32xf32>
    %85 = arith.mulf %80, %82 : vector<2x32xf32>
    %86 = arith.addf %84, %85 : vector<2x32xf32>
    %87 = math.tanh %86 : vector<2x32xf32>
    %88 = arith.mulf %83, %87 : vector<2x32xf32>
    %cst_22 = arith.constant dense<0.000000e+00> : vector<2x128xf32>
    %89 = tpu.matmul %88, %2, %cst_22 {dimension_numbers = #tpu.dot_dimension_numbers<[1], [0], [0], [1], [0, 0, 1, 1], [], []>} : vector<2x32xf32>, vector<32x128xf32>, vector<2x128xf32> -> vector<2x128xf32>
    %90 = arith.addf %19, %89 : vector<2x128xf32>
    %91 = arith.negf %90 : vector<2x128xf32>
    %92 = math.exp %91 : vector<2x128xf32>
    %cst_23 = arith.constant 1.000000e+00 : f32
    %93 = vector.broadcast %cst_23 : f32 to vector<2x128xf32>
    %94 = arith.addf %93, %92 : vector<2x128xf32>
    %95 = arith.divf %93, %94 : vector<2x128xf32>
    %96 = math.tanh %90 : vector<2x128xf32>
    %97 = vector.extract_strided_slice %95 {offsets = [0, 0], sizes = [2, 32], strides = [1, 1]} : vector<2x128xf32> to vector<2x32xf32>
    %98 = vector.extract_strided_slice %95 {offsets = [0, 32], sizes = [2, 32], strides = [1, 1]} : vector<2x128xf32> to vector<2x32xf32>
    %99 = vector.extract_strided_slice %96 {offsets = [0, 64], sizes = [2, 32], strides = [1, 1]} : vector<2x128xf32> to vector<2x32xf32>
    %100 = vector.extract_strided_slice %95 {offsets = [0, 96], sizes = [2, 32], strides = [1, 1]} : vector<2x128xf32> to vector<2x32xf32>
    %101 = arith.mulf %98, %86 : vector<2x32xf32>
    %102 = arith.mulf %97, %99 : vector<2x32xf32>
    %103 = arith.addf %101, %102 : vector<2x32xf32>
    %104 = math.tanh %103 : vector<2x32xf32>
    %105 = arith.mulf %100, %104 : vector<2x32xf32>
    %cst_24 = arith.constant dense<0.000000e+00> : vector<2x128xf32>
    %106 = tpu.matmul %105, %2, %cst_24 {dimension_numbers = #tpu.dot_dimension_numbers<[1], [0], [0], [1], [0, 0, 1, 1], [], []>} : vector<2x32xf32>, vector<32x128xf32>, vector<2x128xf32> -> vector<2x128xf32>
    %107 = arith.addf %23, %106 : vector<2x128xf32>
    %108 = arith.negf %107 : vector<2x128xf32>
    %109 = math.exp %108 : vector<2x128xf32>
    %cst_25 = arith.constant 1.000000e+00 : f32
    %110 = vector.broadcast %cst_25 : f32 to vector<2x128xf32>
    %111 = arith.addf %110, %109 : vector<2x128xf32>
    %112 = arith.divf %110, %111 : vector<2x128xf32>
    %113 = math.tanh %107 : vector<2x128xf32>
    %114 = vector.extract_strided_slice %112 {offsets = [0, 0], sizes = [2, 32], strides = [1, 1]} : vector<2x128xf32> to vector<2x32xf32>
    %115 = vector.extract_strided_slice %112 {offsets = [0, 32], sizes = [2, 32], strides = [1, 1]} : vector<2x128xf32> to vector<2x32xf32>
    %116 = vector.extract_strided_slice %113 {offsets = [0, 64], sizes = [2, 32], strides = [1, 1]} : vector<2x128xf32> to vector<2x32xf32>
    %117 = vector.extract_strided_slice %112 {offsets = [0, 96], sizes = [2, 32], strides = [1, 1]} : vector<2x128xf32> to vector<2x32xf32>
    %118 = arith.mulf %115, %103 : vector<2x32xf32>
    %119 = arith.mulf %114, %116 : vector<2x32xf32>
    %120 = arith.addf %118, %119 : vector<2x32xf32>
    %121 = math.tanh %120 : vector<2x32xf32>
    %122 = arith.mulf %117, %121 : vector<2x32xf32>
    %cst_26 = arith.constant dense<0.000000e+00> : vector<2x128xf32>
    %123 = tpu.matmul %122, %2, %cst_26 {dimension_numbers = #tpu.dot_dimension_numbers<[1], [0], [0], [1], [0, 0, 1, 1], [], []>} : vector<2x32xf32>, vector<32x128xf32>, vector<2x128xf32> -> vector<2x128xf32>
    %124 = arith.addf %27, %123 : vector<2x128xf32>
    %125 = arith.negf %124 : vector<2x128xf32>
    %126 = math.exp %125 : vector<2x128xf32>
    %cst_27 = arith.constant 1.000000e+00 : f32
    %127 = vector.broadcast %cst_27 : f32 to vector<2x128xf32>
    %128 = arith.addf %127, %126 : vector<2x128xf32>
    %129 = arith.divf %127, %128 : vector<2x128xf32>
    %130 = math.tanh %124 : vector<2x128xf32>
    %131 = vector.extract_strided_slice %129 {offsets = [0, 0], sizes = [2, 32], strides = [1, 1]} : vector<2x128xf32> to vector<2x32xf32>
    %132 = vector.extract_strided_slice %129 {offsets = [0, 32], sizes = [2, 32], strides = [1, 1]} : vector<2x128xf32> to vector<2x32xf32>
    %133 = vector.extract_strided_slice %130 {offsets = [0, 64], sizes = [2, 32], strides = [1, 1]} : vector<2x128xf32> to vector<2x32xf32>
    %134 = vector.extract_strided_slice %129 {offsets = [0, 96], sizes = [2, 32], strides = [1, 1]} : vector<2x128xf32> to vector<2x32xf32>
    %135 = arith.mulf %132, %120 : vector<2x32xf32>
    %136 = arith.mulf %131, %133 : vector<2x32xf32>
    %137 = arith.addf %135, %136 : vector<2x32xf32>
    %138 = math.tanh %137 : vector<2x32xf32>
    %139 = arith.mulf %134, %138 : vector<2x32xf32>
    %cst_28 = arith.constant dense<0.000000e+00> : vector<2x128xf32>
    %140 = tpu.matmul %139, %2, %cst_28 {dimension_numbers = #tpu.dot_dimension_numbers<[1], [0], [0], [1], [0, 0, 1, 1], [], []>} : vector<2x32xf32>, vector<32x128xf32>, vector<2x128xf32> -> vector<2x128xf32>
    %141 = arith.addf %31, %140 : vector<2x128xf32>
    %142 = arith.negf %141 : vector<2x128xf32>
    %143 = math.exp %142 : vector<2x128xf32>
    %cst_29 = arith.constant 1.000000e+00 : f32
    %144 = vector.broadcast %cst_29 : f32 to vector<2x128xf32>
    %145 = arith.addf %144, %143 : vector<2x128xf32>
    %146 = arith.divf %144, %145 : vector<2x128xf32>
    %147 = math.tanh %141 : vector<2x128xf32>
    %148 = vector.extract_strided_slice %146 {offsets = [0, 0], sizes = [2, 32], strides = [1, 1]} : vector<2x128xf32> to vector<2x32xf32>
    %149 = vector.extract_strided_slice %146 {offsets = [0, 32], sizes = [2, 32], strides = [1, 1]} : vector<2x128xf32> to vector<2x32xf32>
    %150 = vector.extract_strided_slice %147 {offsets = [0, 64], sizes = [2, 32], strides = [1, 1]} : vector<2x128xf32> to vector<2x32xf32>
    %151 = vector.extract_strided_slice %146 {offsets = [0, 96], sizes = [2, 32], strides = [1, 1]} : vector<2x128xf32> to vector<2x32xf32>
    %152 = arith.mulf %149, %137 : vector<2x32xf32>
    %153 = arith.mulf %148, %150 : vector<2x32xf32>
    %154 = arith.addf %152, %153 : vector<2x32xf32>
    %155 = math.tanh %154 : vector<2x32xf32>
    %156 = arith.mulf %151, %155 : vector<2x32xf32>
    %cst_30 = arith.constant dense<0.000000e+00> : vector<2x128xf32>
    %157 = tpu.matmul %156, %2, %cst_30 {dimension_numbers = #tpu.dot_dimension_numbers<[1], [0], [0], [1], [0, 0, 1, 1], [], []>} : vector<2x32xf32>, vector<32x128xf32>, vector<2x128xf32> -> vector<2x128xf32>
    %158 = arith.addf %35, %157 : vector<2x128xf32>
    %159 = arith.negf %158 : vector<2x128xf32>
    %160 = math.exp %159 : vector<2x128xf32>
    %cst_31 = arith.constant 1.000000e+00 : f32
    %161 = vector.broadcast %cst_31 : f32 to vector<2x128xf32>
    %162 = arith.addf %161, %160 : vector<2x128xf32>
    %163 = arith.divf %161, %162 : vector<2x128xf32>
    %164 = math.tanh %158 : vector<2x128xf32>
    %165 = vector.extract_strided_slice %163 {offsets = [0, 0], sizes = [2, 32], strides = [1, 1]} : vector<2x128xf32> to vector<2x32xf32>
    %166 = vector.extract_strided_slice %163 {offsets = [0, 32], sizes = [2, 32], strides = [1, 1]} : vector<2x128xf32> to vector<2x32xf32>
    %167 = vector.extract_strided_slice %164 {offsets = [0, 64], sizes = [2, 32], strides = [1, 1]} : vector<2x128xf32> to vector<2x32xf32>
    %168 = vector.extract_strided_slice %163 {offsets = [0, 96], sizes = [2, 32], strides = [1, 1]} : vector<2x128xf32> to vector<2x32xf32>
    %169 = arith.mulf %166, %154 : vector<2x32xf32>
    %170 = arith.mulf %165, %167 : vector<2x32xf32>
    %171 = arith.addf %169, %170 : vector<2x32xf32>
    %172 = math.tanh %171 : vector<2x32xf32>
    %173 = arith.mulf %168, %172 : vector<2x32xf32>
    %c0_32 = arith.constant 0 : index
    %c0_33 = arith.constant 0 : index
    %174 = vector.load %arg4[%c0_32, %c0_33] : memref<32x128xf32, #tpu.memory_space<vmem>>, vector<32x128xf32>
    %c0_34 = arith.constant 0 : index
    %c0_35 = arith.constant 0 : index
    %175 = vector.load %arg5[%c0_34, %c0_35] : memref<32x128xf32, #tpu.memory_space<vmem>>, vector<32x128xf32>
    %c0_36 = arith.constant 0 : index
    %c0_37 = arith.constant 0 : index
    %176 = vector.load %arg6[%c0_36, %c0_37] : memref<1x128xf32, #tpu.memory_space<vmem>>, vector<1x128xf32>
    %cst_38 = arith.constant dense<0.000000e+00> : vector<2x128xf32>
    %177 = tpu.matmul %54, %174, %cst_38 {dimension_numbers = #tpu.dot_dimension_numbers<[1], [0], [0], [1], [0, 0, 1, 1], [], []>} : vector<2x32xf32>, vector<32x128xf32>, vector<2x128xf32> -> vector<2x128xf32>
    %178 = vector.broadcast %176 : vector<1x128xf32> to vector<2x128xf32>
    %179 = arith.addf %177, %178 : vector<2x128xf32>
    %cst_39 = arith.constant dense<0.000000e+00> : vector<2x128xf32>
    %180 = tpu.matmul %71, %174, %cst_39 {dimension_numbers = #tpu.dot_dimension_numbers<[1], [0], [0], [1], [0, 0, 1, 1], [], []>} : vector<2x32xf32>, vector<32x128xf32>, vector<2x128xf32> -> vector<2x128xf32>
    %181 = vector.broadcast %176 : vector<1x128xf32> to vector<2x128xf32>
    %182 = arith.addf %180, %181 : vector<2x128xf32>
    %cst_40 = arith.constant dense<0.000000e+00> : vector<2x128xf32>
    %183 = tpu.matmul %88, %174, %cst_40 {dimension_numbers = #tpu.dot_dimension_numbers<[1], [0], [0], [1], [0, 0, 1, 1], [], []>} : vector<2x32xf32>, vector<32x128xf32>, vector<2x128xf32> -> vector<2x128xf32>
    %184 = vector.broadcast %176 : vector<1x128xf32> to vector<2x128xf32>
    %185 = arith.addf %183, %184 : vector<2x128xf32>
    %cst_41 = arith.constant dense<0.000000e+00> : vector<2x128xf32>
    %186 = tpu.matmul %105, %174, %cst_41 {dimension_numbers = #tpu.dot_dimension_numbers<[1], [0], [0], [1], [0, 0, 1, 1], [], []>} : vector<2x32xf32>, vector<32x128xf32>, vector<2x128xf32> -> vector<2x128xf32>
    %187 = vector.broadcast %176 : vector<1x128xf32> to vector<2x128xf32>
    %188 = arith.addf %186, %187 : vector<2x128xf32>
    %cst_42 = arith.constant dense<0.000000e+00> : vector<2x128xf32>
    %189 = tpu.matmul %122, %174, %cst_42 {dimension_numbers = #tpu.dot_dimension_numbers<[1], [0], [0], [1], [0, 0, 1, 1], [], []>} : vector<2x32xf32>, vector<32x128xf32>, vector<2x128xf32> -> vector<2x128xf32>
    %190 = vector.broadcast %176 : vector<1x128xf32> to vector<2x128xf32>
    %191 = arith.addf %189, %190 : vector<2x128xf32>
    %cst_43 = arith.constant dense<0.000000e+00> : vector<2x128xf32>
    %192 = tpu.matmul %139, %174, %cst_43 {dimension_numbers = #tpu.dot_dimension_numbers<[1], [0], [0], [1], [0, 0, 1, 1], [], []>} : vector<2x32xf32>, vector<32x128xf32>, vector<2x128xf32> -> vector<2x128xf32>
    %193 = vector.broadcast %176 : vector<1x128xf32> to vector<2x128xf32>
    %194 = arith.addf %192, %193 : vector<2x128xf32>
    %cst_44 = arith.constant dense<0.000000e+00> : vector<2x128xf32>
    %195 = tpu.matmul %156, %174, %cst_44 {dimension_numbers = #tpu.dot_dimension_numbers<[1], [0], [0], [1], [0, 0, 1, 1], [], []>} : vector<2x32xf32>, vector<32x128xf32>, vector<2x128xf32> -> vector<2x128xf32>
    %196 = vector.broadcast %176 : vector<1x128xf32> to vector<2x128xf32>
    %197 = arith.addf %195, %196 : vector<2x128xf32>
    %cst_45 = arith.constant dense<0.000000e+00> : vector<2x128xf32>
    %198 = tpu.matmul %173, %174, %cst_45 {dimension_numbers = #tpu.dot_dimension_numbers<[1], [0], [0], [1], [0, 0, 1, 1], [], []>} : vector<2x32xf32>, vector<32x128xf32>, vector<2x128xf32> -> vector<2x128xf32>
    %199 = vector.broadcast %176 : vector<1x128xf32> to vector<2x128xf32>
    %200 = arith.addf %198, %199 : vector<2x128xf32>
    %cst_46 = arith.constant 0.000000e+00 : f32
    %201 = vector.broadcast %cst_46 : f32 to vector<2x32xf32>
    %cst_47 = arith.constant 0.000000e+00 : f32
    %202 = vector.broadcast %cst_47 : f32 to vector<2x32xf32>
    %cst_48 = arith.constant dense<0.000000e+00> : vector<2x128xf32>
    %203 = tpu.matmul %201, %175, %cst_48 {dimension_numbers = #tpu.dot_dimension_numbers<[1], [0], [0], [1], [0, 0, 1, 1], [], []>} : vector<2x32xf32>, vector<32x128xf32>, vector<2x128xf32> -> vector<2x128xf32>
    %204 = arith.addf %179, %203 : vector<2x128xf32>
    %205 = arith.negf %204 : vector<2x128xf32>
    %206 = math.exp %205 : vector<2x128xf32>
    %cst_49 = arith.constant 1.000000e+00 : f32
    %207 = vector.broadcast %cst_49 : f32 to vector<2x128xf32>
    %208 = arith.addf %207, %206 : vector<2x128xf32>
    %209 = arith.divf %207, %208 : vector<2x128xf32>
    %210 = math.tanh %204 : vector<2x128xf32>
    %211 = vector.extract_strided_slice %209 {offsets = [0, 0], sizes = [2, 32], strides = [1, 1]} : vector<2x128xf32> to vector<2x32xf32>
    %212 = vector.extract_strided_slice %209 {offsets = [0, 32], sizes = [2, 32], strides = [1, 1]} : vector<2x128xf32> to vector<2x32xf32>
    %213 = vector.extract_strided_slice %210 {offsets = [0, 64], sizes = [2, 32], strides = [1, 1]} : vector<2x128xf32> to vector<2x32xf32>
    %214 = vector.extract_strided_slice %209 {offsets = [0, 96], sizes = [2, 32], strides = [1, 1]} : vector<2x128xf32> to vector<2x32xf32>
    %215 = arith.mulf %212, %202 : vector<2x32xf32>
    %216 = arith.mulf %211, %213 : vector<2x32xf32>
    %217 = arith.addf %215, %216 : vector<2x32xf32>
    %218 = math.tanh %217 : vector<2x32xf32>
    %219 = arith.mulf %214, %218 : vector<2x32xf32>
    %cst_50 = arith.constant dense<0.000000e+00> : vector<2x128xf32>
    %220 = tpu.matmul %219, %175, %cst_50 {dimension_numbers = #tpu.dot_dimension_numbers<[1], [0], [0], [1], [0, 0, 1, 1], [], []>} : vector<2x32xf32>, vector<32x128xf32>, vector<2x128xf32> -> vector<2x128xf32>
    %221 = arith.addf %182, %220 : vector<2x128xf32>
    %222 = arith.negf %221 : vector<2x128xf32>
    %223 = math.exp %222 : vector<2x128xf32>
    %cst_51 = arith.constant 1.000000e+00 : f32
    %224 = vector.broadcast %cst_51 : f32 to vector<2x128xf32>
    %225 = arith.addf %224, %223 : vector<2x128xf32>
    %226 = arith.divf %224, %225 : vector<2x128xf32>
    %227 = math.tanh %221 : vector<2x128xf32>
    %228 = vector.extract_strided_slice %226 {offsets = [0, 0], sizes = [2, 32], strides = [1, 1]} : vector<2x128xf32> to vector<2x32xf32>
    %229 = vector.extract_strided_slice %226 {offsets = [0, 32], sizes = [2, 32], strides = [1, 1]} : vector<2x128xf32> to vector<2x32xf32>
    %230 = vector.extract_strided_slice %227 {offsets = [0, 64], sizes = [2, 32], strides = [1, 1]} : vector<2x128xf32> to vector<2x32xf32>
    %231 = vector.extract_strided_slice %226 {offsets = [0, 96], sizes = [2, 32], strides = [1, 1]} : vector<2x128xf32> to vector<2x32xf32>
    %232 = arith.mulf %229, %217 : vector<2x32xf32>
    %233 = arith.mulf %228, %230 : vector<2x32xf32>
    %234 = arith.addf %232, %233 : vector<2x32xf32>
    %235 = math.tanh %234 : vector<2x32xf32>
    %236 = arith.mulf %231, %235 : vector<2x32xf32>
    %cst_52 = arith.constant dense<0.000000e+00> : vector<2x128xf32>
    %237 = tpu.matmul %236, %175, %cst_52 {dimension_numbers = #tpu.dot_dimension_numbers<[1], [0], [0], [1], [0, 0, 1, 1], [], []>} : vector<2x32xf32>, vector<32x128xf32>, vector<2x128xf32> -> vector<2x128xf32>
    %238 = arith.addf %185, %237 : vector<2x128xf32>
    %239 = arith.negf %238 : vector<2x128xf32>
    %240 = math.exp %239 : vector<2x128xf32>
    %cst_53 = arith.constant 1.000000e+00 : f32
    %241 = vector.broadcast %cst_53 : f32 to vector<2x128xf32>
    %242 = arith.addf %241, %240 : vector<2x128xf32>
    %243 = arith.divf %241, %242 : vector<2x128xf32>
    %244 = math.tanh %238 : vector<2x128xf32>
    %245 = vector.extract_strided_slice %243 {offsets = [0, 0], sizes = [2, 32], strides = [1, 1]} : vector<2x128xf32> to vector<2x32xf32>
    %246 = vector.extract_strided_slice %243 {offsets = [0, 32], sizes = [2, 32], strides = [1, 1]} : vector<2x128xf32> to vector<2x32xf32>
    %247 = vector.extract_strided_slice %244 {offsets = [0, 64], sizes = [2, 32], strides = [1, 1]} : vector<2x128xf32> to vector<2x32xf32>
    %248 = vector.extract_strided_slice %243 {offsets = [0, 96], sizes = [2, 32], strides = [1, 1]} : vector<2x128xf32> to vector<2x32xf32>
    %249 = arith.mulf %246, %234 : vector<2x32xf32>
    %250 = arith.mulf %245, %247 : vector<2x32xf32>
    %251 = arith.addf %249, %250 : vector<2x32xf32>
    %252 = math.tanh %251 : vector<2x32xf32>
    %253 = arith.mulf %248, %252 : vector<2x32xf32>
    %cst_54 = arith.constant dense<0.000000e+00> : vector<2x128xf32>
    %254 = tpu.matmul %253, %175, %cst_54 {dimension_numbers = #tpu.dot_dimension_numbers<[1], [0], [0], [1], [0, 0, 1, 1], [], []>} : vector<2x32xf32>, vector<32x128xf32>, vector<2x128xf32> -> vector<2x128xf32>
    %255 = arith.addf %188, %254 : vector<2x128xf32>
    %256 = arith.negf %255 : vector<2x128xf32>
    %257 = math.exp %256 : vector<2x128xf32>
    %cst_55 = arith.constant 1.000000e+00 : f32
    %258 = vector.broadcast %cst_55 : f32 to vector<2x128xf32>
    %259 = arith.addf %258, %257 : vector<2x128xf32>
    %260 = arith.divf %258, %259 : vector<2x128xf32>
    %261 = math.tanh %255 : vector<2x128xf32>
    %262 = vector.extract_strided_slice %260 {offsets = [0, 0], sizes = [2, 32], strides = [1, 1]} : vector<2x128xf32> to vector<2x32xf32>
    %263 = vector.extract_strided_slice %260 {offsets = [0, 32], sizes = [2, 32], strides = [1, 1]} : vector<2x128xf32> to vector<2x32xf32>
    %264 = vector.extract_strided_slice %261 {offsets = [0, 64], sizes = [2, 32], strides = [1, 1]} : vector<2x128xf32> to vector<2x32xf32>
    %265 = vector.extract_strided_slice %260 {offsets = [0, 96], sizes = [2, 32], strides = [1, 1]} : vector<2x128xf32> to vector<2x32xf32>
    %266 = arith.mulf %263, %251 : vector<2x32xf32>
    %267 = arith.mulf %262, %264 : vector<2x32xf32>
    %268 = arith.addf %266, %267 : vector<2x32xf32>
    %269 = math.tanh %268 : vector<2x32xf32>
    %270 = arith.mulf %265, %269 : vector<2x32xf32>
    %cst_56 = arith.constant dense<0.000000e+00> : vector<2x128xf32>
    %271 = tpu.matmul %270, %175, %cst_56 {dimension_numbers = #tpu.dot_dimension_numbers<[1], [0], [0], [1], [0, 0, 1, 1], [], []>} : vector<2x32xf32>, vector<32x128xf32>, vector<2x128xf32> -> vector<2x128xf32>
    %272 = arith.addf %191, %271 : vector<2x128xf32>
    %273 = arith.negf %272 : vector<2x128xf32>
    %274 = math.exp %273 : vector<2x128xf32>
    %cst_57 = arith.constant 1.000000e+00 : f32
    %275 = vector.broadcast %cst_57 : f32 to vector<2x128xf32>
    %276 = arith.addf %275, %274 : vector<2x128xf32>
    %277 = arith.divf %275, %276 : vector<2x128xf32>
    %278 = math.tanh %272 : vector<2x128xf32>
    %279 = vector.extract_strided_slice %277 {offsets = [0, 0], sizes = [2, 32], strides = [1, 1]} : vector<2x128xf32> to vector<2x32xf32>
    %280 = vector.extract_strided_slice %277 {offsets = [0, 32], sizes = [2, 32], strides = [1, 1]} : vector<2x128xf32> to vector<2x32xf32>
    %281 = vector.extract_strided_slice %278 {offsets = [0, 64], sizes = [2, 32], strides = [1, 1]} : vector<2x128xf32> to vector<2x32xf32>
    %282 = vector.extract_strided_slice %277 {offsets = [0, 96], sizes = [2, 32], strides = [1, 1]} : vector<2x128xf32> to vector<2x32xf32>
    %283 = arith.mulf %280, %268 : vector<2x32xf32>
    %284 = arith.mulf %279, %281 : vector<2x32xf32>
    %285 = arith.addf %283, %284 : vector<2x32xf32>
    %286 = math.tanh %285 : vector<2x32xf32>
    %287 = arith.mulf %282, %286 : vector<2x32xf32>
    %cst_58 = arith.constant dense<0.000000e+00> : vector<2x128xf32>
    %288 = tpu.matmul %287, %175, %cst_58 {dimension_numbers = #tpu.dot_dimension_numbers<[1], [0], [0], [1], [0, 0, 1, 1], [], []>} : vector<2x32xf32>, vector<32x128xf32>, vector<2x128xf32> -> vector<2x128xf32>
    %289 = arith.addf %194, %288 : vector<2x128xf32>
    %290 = arith.negf %289 : vector<2x128xf32>
    %291 = math.exp %290 : vector<2x128xf32>
    %cst_59 = arith.constant 1.000000e+00 : f32
    %292 = vector.broadcast %cst_59 : f32 to vector<2x128xf32>
    %293 = arith.addf %292, %291 : vector<2x128xf32>
    %294 = arith.divf %292, %293 : vector<2x128xf32>
    %295 = math.tanh %289 : vector<2x128xf32>
    %296 = vector.extract_strided_slice %294 {offsets = [0, 0], sizes = [2, 32], strides = [1, 1]} : vector<2x128xf32> to vector<2x32xf32>
    %297 = vector.extract_strided_slice %294 {offsets = [0, 32], sizes = [2, 32], strides = [1, 1]} : vector<2x128xf32> to vector<2x32xf32>
    %298 = vector.extract_strided_slice %295 {offsets = [0, 64], sizes = [2, 32], strides = [1, 1]} : vector<2x128xf32> to vector<2x32xf32>
    %299 = vector.extract_strided_slice %294 {offsets = [0, 96], sizes = [2, 32], strides = [1, 1]} : vector<2x128xf32> to vector<2x32xf32>
    %300 = arith.mulf %297, %285 : vector<2x32xf32>
    %301 = arith.mulf %296, %298 : vector<2x32xf32>
    %302 = arith.addf %300, %301 : vector<2x32xf32>
    %303 = math.tanh %302 : vector<2x32xf32>
    %304 = arith.mulf %299, %303 : vector<2x32xf32>
    %cst_60 = arith.constant dense<0.000000e+00> : vector<2x128xf32>
    %305 = tpu.matmul %304, %175, %cst_60 {dimension_numbers = #tpu.dot_dimension_numbers<[1], [0], [0], [1], [0, 0, 1, 1], [], []>} : vector<2x32xf32>, vector<32x128xf32>, vector<2x128xf32> -> vector<2x128xf32>
    %306 = arith.addf %197, %305 : vector<2x128xf32>
    %307 = arith.negf %306 : vector<2x128xf32>
    %308 = math.exp %307 : vector<2x128xf32>
    %cst_61 = arith.constant 1.000000e+00 : f32
    %309 = vector.broadcast %cst_61 : f32 to vector<2x128xf32>
    %310 = arith.addf %309, %308 : vector<2x128xf32>
    %311 = arith.divf %309, %310 : vector<2x128xf32>
    %312 = math.tanh %306 : vector<2x128xf32>
    %313 = vector.extract_strided_slice %311 {offsets = [0, 0], sizes = [2, 32], strides = [1, 1]} : vector<2x128xf32> to vector<2x32xf32>
    %314 = vector.extract_strided_slice %311 {offsets = [0, 32], sizes = [2, 32], strides = [1, 1]} : vector<2x128xf32> to vector<2x32xf32>
    %315 = vector.extract_strided_slice %312 {offsets = [0, 64], sizes = [2, 32], strides = [1, 1]} : vector<2x128xf32> to vector<2x32xf32>
    %316 = vector.extract_strided_slice %311 {offsets = [0, 96], sizes = [2, 32], strides = [1, 1]} : vector<2x128xf32> to vector<2x32xf32>
    %317 = arith.mulf %314, %302 : vector<2x32xf32>
    %318 = arith.mulf %313, %315 : vector<2x32xf32>
    %319 = arith.addf %317, %318 : vector<2x32xf32>
    %320 = math.tanh %319 : vector<2x32xf32>
    %321 = arith.mulf %316, %320 : vector<2x32xf32>
    %cst_62 = arith.constant dense<0.000000e+00> : vector<2x128xf32>
    %322 = tpu.matmul %321, %175, %cst_62 {dimension_numbers = #tpu.dot_dimension_numbers<[1], [0], [0], [1], [0, 0, 1, 1], [], []>} : vector<2x32xf32>, vector<32x128xf32>, vector<2x128xf32> -> vector<2x128xf32>
    %323 = arith.addf %200, %322 : vector<2x128xf32>
    %324 = arith.negf %323 : vector<2x128xf32>
    %325 = math.exp %324 : vector<2x128xf32>
    %cst_63 = arith.constant 1.000000e+00 : f32
    %326 = vector.broadcast %cst_63 : f32 to vector<2x128xf32>
    %327 = arith.addf %326, %325 : vector<2x128xf32>
    %328 = arith.divf %326, %327 : vector<2x128xf32>
    %329 = math.tanh %323 : vector<2x128xf32>
    %330 = vector.extract_strided_slice %328 {offsets = [0, 0], sizes = [2, 32], strides = [1, 1]} : vector<2x128xf32> to vector<2x32xf32>
    %331 = vector.extract_strided_slice %328 {offsets = [0, 32], sizes = [2, 32], strides = [1, 1]} : vector<2x128xf32> to vector<2x32xf32>
    %332 = vector.extract_strided_slice %329 {offsets = [0, 64], sizes = [2, 32], strides = [1, 1]} : vector<2x128xf32> to vector<2x32xf32>
    %333 = vector.extract_strided_slice %328 {offsets = [0, 96], sizes = [2, 32], strides = [1, 1]} : vector<2x128xf32> to vector<2x32xf32>
    %334 = arith.mulf %331, %319 : vector<2x32xf32>
    %335 = arith.mulf %330, %332 : vector<2x32xf32>
    %336 = arith.addf %334, %335 : vector<2x32xf32>
    %337 = math.tanh %336 : vector<2x32xf32>
    %338 = arith.mulf %333, %337 : vector<2x32xf32>
    %c0_64 = arith.constant 0 : index
    %c0_65 = arith.constant 0 : index
    %339 = vector.load %arg7[%c0_64, %c0_65] : memref<32x16xf32, #tpu.memory_space<vmem>>, vector<32x16xf32>
    %cst_66 = arith.constant dense<0.000000e+00> : vector<2x16xf32>
    %340 = tpu.matmul %338, %339, %cst_66 {dimension_numbers = #tpu.dot_dimension_numbers<[1], [0], [0], [1], [0, 0, 1, 1], [], []>} : vector<2x32xf32>, vector<32x16xf32>, vector<2x16xf32> -> vector<2x16xf32>
    %c0_67 = arith.constant 0 : index
    %c0_68 = arith.constant 0 : index
    %341 = vector.load %arg8[%c0_67, %c0_68] : memref<1x16xf32, #tpu.memory_space<vmem>>, vector<1x16xf32>
    %342 = vector.broadcast %341 : vector<1x16xf32> to vector<2x16xf32>
    %343 = arith.addf %340, %342 : vector<2x16xf32>
    %cst_69 = arith.constant 0.000000e+00 : f32
    %344 = vector.broadcast %cst_69 : f32 to vector<2x16xf32>
    %345 = arith.maximumf %343, %344 : vector<2x16xf32>
    %c0_70 = arith.constant 0 : index
    %c0_71 = arith.constant 0 : index
    %346 = vector.load %arg9[%c0_70, %c0_71] : memref<16x1xf32, #tpu.memory_space<vmem>>, vector<16x1xf32>
    %cst_72 = arith.constant dense<0.000000e+00> : vector<2x1xf32>
    %347 = tpu.matmul %345, %346, %cst_72 {dimension_numbers = #tpu.dot_dimension_numbers<[1], [0], [0], [1], [0, 0, 1, 1], [], []>} : vector<2x16xf32>, vector<16x1xf32>, vector<2x1xf32> -> vector<2x1xf32>
    %c0_73 = arith.constant 0 : index
    %c0_74 = arith.constant 0 : index
    %348 = vector.load %arg10[%c0_73, %c0_74] : memref<1x1xf32, #tpu.memory_space<vmem>>, vector<1x1xf32>
    %349 = vector.broadcast %348 : vector<1x1xf32> to vector<2x1xf32>
    %350 = arith.addf %347, %349 : vector<2x1xf32>
    %351 = arith.negf %350 : vector<2x1xf32>
    %352 = math.exp %351 : vector<2x1xf32>
    %cst_75 = arith.constant 1.000000e+00 : f32
    %353 = vector.broadcast %cst_75 : f32 to vector<2x1xf32>
    %354 = arith.addf %353, %352 : vector<2x1xf32>
    %355 = arith.divf %353, %354 : vector<2x1xf32>
    %c0_76 = arith.constant 0 : index
    %c0_77 = arith.constant 0 : index
    %356 = vector.load %arg11[%c0_76, %c0_77] : memref<2x1xf32, #tpu.memory_space<vmem>>, vector<2x1xf32>
    tpu.vector_store %arg11[%c0_76, %c0_77], %355 {strides = array<i32>} : memref<2x1xf32, #tpu.memory_space<vmem>>, vector<2x1xf32>,
    return
  }
}

</mosaic_0001>

<bundles_post_ra>
// kernel: eel_health_lstm_forward.1
= control target key start
LH: loop header
LB: loop body
LE: loop exit
PB: predicated region body
PF: predicated region fallthrough
CT: control target
= control target key end

     0   :  { %s4476_s0 = inlined_call_operand.vmem [shape: f32[2,32], index: 0, kind: input, shape index: {}]   ;;  %s4477_s1 = inlined_call_operand.hbm [shape: f32[4,128], index: 1, kind: input, shape index: {}]   ;;  %s4478_s2 = inlined_call_operand.vmem [shape: f32[32,128], index: 2, kind: input, shape index: {}]   ;;  %s4479_s3 = inlined_call_operand.vmem [shape: f32[1,128], index: 3, kind: input, shape index: {}]   ;;  %s4480_s4 = inlined_call_operand.vmem [shape: f32[32,128], index: 4, kind: input, shape index: {}]   ;;  %s4481_s5 = inlined_call_operand.vmem [shape: f32[32,128], index: 5, kind: input, shape index: {}]   ;;  %s4482_s6 = inlined_call_operand.vmem [shape: f32[1,128], index: 6, kind: input, shape index: {}]   ;;  %s4483_s7 = inlined_call_operand.vmem [shape: f32[32,16], index: 7, kind: input, shape index: {}]   ;;  %s4484_s8 = inlined_call_operand.hbm [shape: f32[1,16], index: 8, kind: input, shape index: {}]   ;;  %s4485_s9 = inlined_call_operand.vmem [shape: f32[16,1], index: 9, kind: input, shape index: {}]   ;;  %s4486_s10 = inlined_call_operand.<no memory space> [shape: f32[1,1], index: 10, kind: input, shape index: {}]   ;;  %s4487_s11 = inlined_call_operand.vmem [shape: f32[2,1], index: 11, kind: output, shape index: {}]  }
   0x1   :  { %v16_v0 = vstv %s4486_s10 }
   0x2   :  { %17 = vst [vmem:[#allocation2] sm:$0x1] %v16_v0 }
   0x3   :  { %18 = vsyncpa [#allocation4], 0 }
   0x4   :  { %19 = vsyncpa [#allocation6], 0  ;;  %s3953_s19 = smov [#allocation3]   ;;  %s3954_s21 = smov [#allocation5]  }
   0x5   :  { %s28_s20 = sshll.u32 %s3953_s19, 4  ;;  %s50_s22 = sshll.u32 %s3954_s21, 4  ;;  %s29_s20 = int_to_ptr.vmem [resolvable:$true] %s28_s20  ;;  %s51_s22 = int_to_ptr.vmem [resolvable:$true] %s50_s22 }
   0x6   :  { %s3905_s25 = scalar_lea.hbm %s4477_s1, 64 }
   0x7   :  { %p3906_p0 = scmp.ne.s32.totalorder %s4477_s1, %s3905_s25  ;;  %p3909_p1 = scmp.lt.u32.totalorder %s3905_s25, %s4477_s1 }
   0x9   :  { %p3911_p2 = pnand %p3909_p1, %p3906_p0 }
   0xb   :  { %3914 = shalt.err (!%p3911_p2)
}
   0xc   :  { %s3915_s10 = scalar_lea.vmem %s29_s20, 64  ;;  %p3920_p4 = scmp.lt.s32.totalorder %s29_s20, %s29_s20 }
   0xd   :  { %p3916_p3 = scmp.ne.s32.totalorder %s29_s20, %s3915_s10  ;;  %p3921_p5 = scmp.lt.s32.totalorder %s3915_s10, %s3915_s10 }
   0xf   :  { %p3922_p6 = por %p3921_p5, %p3920_p4 }
  0x11   :  { %p3923_p7 = pnand %p3922_p6, %p3916_p3 }
  0x13   :  { %3926 = shalt.err (!%p3923_p7)
}
  0x14   :  { %31 = dma.hbm_to_vmem [thread:$0]  %s4477_s1, 64, %s29_s20, [#allocation4]  }
  0x15   :  { %s3927_s15 = scalar_lea.hbm %s4484_s8, 16 }
  0x16   :  { %p3928_p8 = scmp.ne.s32.totalorder %s4484_s8, %s3927_s15  ;;  %p3931_p9 = scmp.lt.u32.totalorder %s3927_s15, %s4484_s8 }
  0x18   :  { %p3933_p10 = pnand %p3931_p9, %p3928_p8 }
  0x1a   :  { %3936 = shalt.err (!%p3933_p10)
}
  0x1b   :  { %s3937_s21 = scalar_lea.vmem %s51_s22, 16  ;;  %s3941_s23 = scalar_lea.vmem %s51_s22, 32 }
  0x1c   :  { %p3938_p11 = scmp.ne.s32.totalorder %s51_s22, %s3937_s21  ;;  %p3942_p12 = scmp.lt.s32.totalorder %s51_s22, %s51_s22 }
  0x1d   :  { %p3943_p13 = scmp.lt.s32.totalorder %s3941_s23, %s3937_s21 }
  0x1f   :  { %p3944_p0 = por %p3943_p13, %p3942_p12 }
  0x21   :  { %p3945_p1 = pnand %p3944_p0, %p3938_p11 }
  0x23   :  { %3948 = shalt.err (!%p3945_p1)
}
  0x24   :  { %53 = dma.hbm_to_vmem [thread:$0]  %s4484_s8, 16, %s51_s22, [#allocation6]  }
  0x25   :  { %3949 = dma.done.wait [#allocation4], 64  }
  0x26   :  { %3950 = vsyncadd [#allocation4], 4294967232 }
  0x27   :  { %3951 = dma.done.wait [#allocation6], 16  }
  0x28   :  { %3952 = vsyncadd [#allocation6], 4294967280  ;;  %v3955_v1 = vmov 0.0   ;;  %vm3956_vm0 = vmmov 0   ;;  %vm81_vm1 = vcmask 1043456   ;;  %vm77_vm2 = vcmask 31744  }
  0x29   :  { %3236 = vmatprep.subr.mxu0 %v3955_v1  ;;  %3241 = vmatprep.subr.mxu1 %v3955_v1  ;;  %v4063_v2 = vld [vmem:[%s4476_s0] sm:$0x3]  ;;  %s3957_s8 = smov 120   ;;  %s3958_s22 = smov 104   ;;  %v67_v6 = vld [vmem:[%s4478_s2 + $0x8] sm:$0xff]  ;;  %v3960_v10 = vmov 0.0|0.0  }
  0x2a   :  { %3238 = vmatprep.mubr.msk.f32.mxu0 %vm3956_vm0, %v3955_v1  ;;  %3243 = vmatprep.mubr.msk.f32.mxu1 %vm3956_vm0, %v3955_v1  ;;  %v4065_v3 = vld [vmem:[#allocation3] sm:$0xf]  ;;  %s3959_s0 = smov 112   ;;  %v68_v11 = vld [vmem:[%s4478_s2 + $0x10] sm:$0xff]  ;;  %v69_v12 = vld [vmem:[%s4478_s2 + $0x18] sm:$0xff]  ;;  %s3961_s15 = smov 64  }
  0x2b   :  { %229 = vrot.lane.b32.xlu0 %v4063_v2, %s3957_s8  ;;  %525 = vrot.lane.b32.xlu1 %v4063_v2, %s3958_s22  ;;  %v66_v5 = vld [vmem:[%s4478_s2] sm:$0xff]  ;;  %v4111_v13 = vpack.c.bf16 %v69_v12, %v68_v11  ;;  %s3962_s16 = smov 32   ;;  %s3964_s17 = smov 108   ;;  %vm673_vm3 = vcmask 261120   ;;  %vm2943_vm4 = vcmask 130048   ;;  %vm3023_vm5 = vcmask 1024  }
  0x2c   :  { %3237 = vmatpush3.msk.msra.mxu0 %vm81_vm1, %v4065_v3  ;;  %3242 = vmatpush3.msk.msra.mxu1 %vm81_vm1, %v4065_v3  ;;  %v4100_v9 = vpack.c.bf16 %v67_v6, %v66_v5  ;;  %v4128_v14 = vld [vmem:[%s4479_s3] ss:$0 sm:$0xff]  ;;  %s3963_s3 = smov 124   ;;  %s3965_s18 = smov 116  }
  0x2d   :  { %3246 = vmatprep.subr.mxu0 %v3955_v1  ;;  %3239 = vmatmul.mubr.msk.f32.vlgmr.msra.gmra.mrb[0].mxu0 %vm77_vm2, %v4063_v2  ;;  %s3966_s19 = smov 100  }
  0x2e   :  { %3247 = vmatpush3.msk.msra.mxu0 %vm81_vm1, %v4065_v3  ;;  %3248 = vmatprep.mubr.msk.f32.mxu0 %vm3956_vm0, %v3955_v1 }
  0x2f   :  { %377 = vrot.lane.b32.xlu0 %v4063_v2, %s3959_s0  ;;  %3256 = vmatprep.subr.mxu0 %v3955_v1 }
  0x30   :  { %3251 = vmatprep.subr.mxu1 %v3955_v1 }
  0x9d   :  { %v230_v4 = vpop.permute.xlu0 %229  ;;  %v526_v8 = vpop.permute.xlu1 %525 }
  0x9e   :  { %3249 = vmatmul.mubr.msk.f32.vlgmr.msra.gmra.mrb[2].mxu0 %vm77_vm2, %v230_v4 }
  0x9f   :  { %3257 = vmatpush3.msk.msra.mxu0 %vm81_vm1, %v4065_v3  ;;  %3258 = vmatprep.mubr.msk.f32.mxu0 %vm3956_vm0, %v3955_v1 }
  0xa0   :  { %3266 = vmatprep.subr.mxu0 %v3955_v1 }
  0xa1   :  { %v378_v7 = vpop.permute.xlu0 %377 }
  0xa2   :  { %3259 = vmatmul.mubr.msk.f32.vlgmr.msra.gmra.mrb[4].mxu0 %vm77_vm2, %v378_v7 }
  0xa3   :  { %3267 = vmatpush3.msk.msra.mxu0 %vm81_vm1, %v4065_v3  ;;  %3268 = vmatprep.mubr.msk.f32.mxu0 %vm3956_vm0, %v3955_v1 }
  0xa4   :  { %3558 = vmatprep.subr.bf16.mxu0 %v3960_v10 }
  0xa6   :  { %3269 = vmatmul.mubr.msk.f32.vlgmr.msra.gmra.mrb[6].mxu0 %vm77_vm2, %v526_v8 }
  0xa7   :  { %3560 = vmatpush3.bf16.msra.mxu0 %v4100_v9  ;;  %3284 = vmatprep.mubr.msk.f32.mxu0 %vm3956_vm0, %v3955_v1 }
  0xa8   :  { %3561 = vmatprep.subr.bf16.mxu0 %v3960_v10 }
  0xab   :  { %3563 = vmatpush3.bf16.msra.mxu0 %v4111_v13 }
  0xac   :  { %3570 = vmatprep.subr.bf16.mxu0 %v3960_v10 }
  0xae   :  { %3285 = vmatmul.mubr.f32.vlgmr.msra.gmra.mrb[0].mxu0 %v3955_v1 }
  0xaf   :  { %3572 = vmatpush3.bf16.msra.mxu0 %v4100_v9  ;;  %3306 = vmatprep.mubr.msk.f32.mxu0 %vm3956_vm0, %v3955_v1 }
  0xb0   :  { %3573 = vmatprep.subr.bf16.mxu0 %v3960_v10 }
  0xb3   :  { %3575 = vmatpush3.bf16.msra.mxu0 %v4111_v13 }
  0xb4   :  { %3582 = vmatprep.subr.bf16.mxu0 %v3960_v10 }
 0x181   :  { %v743_v15 = vpop.f32.mrb[0].mxu0 }
 0x182   :  { %v3711_v16 = vadd.f32 %v4128_v14, %v743_v15  ;;  %v3286_v17 = vpop.f32.mrb[1].mxu0 }
 0x184   :  { %3773 = vtanh.f32 %v3711_v16  ;;  %v3048_v19 = vmul.f32 -1.442695, %v3711_v16 }
 0x186   :  { %3775 = vpow2.f32 %v3048_v19 }
 0x18e   :  { %v3774_v18 = vpop.eup %3773 }
 0x18f   :  { %757 = vrot.lane.b32.xlu1 %v3774_v18, %s3961_s15 }
 0x190   :  { %v3776_v20 = vpop.eup %3775 }
 0x191   :  { %v751_v21 = vadd.f32 1.0, %v3776_v20 }
 0x193   :  { %3777 = vrcp.f32 %v751_v21 }
 0x19d   :  { %v3778_v22 = vpop.eup %3777 }
 0x19e   :  { %v755_v25 = vmul.f32 0.0, %v3778_v22 }
 0x201   :  { %v758_v23 = vpop.permute.xlu1 %757 }
 0x202   :  { %v760_v24 = vmul.f32 %v3778_v22, %v758_v23 }
 0x204   :  { %762 = vrot.lane.b32.xlu0 %v760_v24, %s3962_s16 }
 0x208   :  { %155 = vrot.lane.b32.xlu0 %v4063_v2, %s3963_s3 }
 0x20c   :  { %451 = vrot.lane.b32.xlu0 %v4063_v2, %s3964_s17 }
 0x276   :  { %v763_v26 = vpop.permute.xlu0 %762 }
 0x277   :  { %v765_v27 = vadd.f32 %v763_v26, %v755_v25 }
 0x279   :  { %3779 = vtanh.f32 %v765_v27 }
 0x27a   :  { %v156_v28 = vpop.permute.xlu0 %155 }
 0x27b   :  { %3244 = vmatmul.mubr.msk.f32.vlgmr.msra.gmra.mrb[0].mxu1 %vm77_vm2, %v156_v28 }
 0x27c   :  { %3252 = vmatpush3.msk.msra.mxu1 %vm81_vm1, %v4065_v3  ;;  %3253 = vmatprep.mubr.msk.f32.mxu1 %vm3956_vm0, %v3955_v1 }
 0x27d   :  { %3261 = vmatprep.subr.mxu1 %v3955_v1 }
 0x27e   :  { %v452_v33 = vpop.permute.xlu0 %451 }
 0x283   :  { %v3780_v29 = vpop.eup %3779 }
 0x284   :  { %768 = vrot.lane.b32.xlu1 %v3780_v29, %s3961_s15 }
 0x288   :  { %303 = vrot.lane.b32.xlu1 %v4063_v2, %s3965_s18 }
 0x28c   :  { %599 = vrot.lane.b32.xlu1 %v4063_v2, %s3966_s19 }
 0x2f6   :  { %v769_v30 = vpop.permute.xlu1 %768 }
 0x2f7   :  { %v771_v31 = vmul.f32 %v3778_v22, %v769_v30 }
 0x2f9   :  { %773 = vrot.lane.b32.xlu0 %v771_v31, %s3962_s16 }
 0x2fa   :  { %v304_v32 = vpop.permute.xlu1 %303 }
 0x2fb   :  { %3254 = vmatmul.mubr.msk.f32.vlgmr.msra.gmra.mrb[2].mxu1 %vm77_vm2, %v304_v32 }
 0x2fc   :  { %3262 = vmatpush3.msk.msra.mxu1 %vm81_vm1, %v4065_v3  ;;  %3263 = vmatprep.mubr.msk.f32.mxu1 %vm3956_vm0, %v3955_v1 }
 0x2fd   :  { %3271 = vmatprep.subr.mxu1 %v3955_v1 }
 0x2fe   :  { %v600_v34 = vpop.permute.xlu1 %599 }
 0x2ff   :  { %3264 = vmatmul.mubr.msk.f32.vlgmr.msra.gmra.mrb[4].mxu1 %vm77_vm2, %v452_v33 }
 0x300   :  { %3272 = vmatpush3.msk.msra.mxu1 %vm81_vm1, %v4065_v3  ;;  %3273 = vmatprep.mubr.msk.f32.mxu1 %vm3956_vm0, %v3955_v1 }
 0x301   :  { %3564 = vmatprep.subr.bf16.mxu1 %v3960_v10 }
 0x303   :  { %3274 = vmatmul.mubr.msk.f32.vlgmr.msra.gmra.mrb[6].mxu1 %vm77_vm2, %v600_v34 }
 0x304   :  { %3566 = vmatpush3.bf16.msra.mxu1 %v4100_v9  ;;  %3295 = vmatprep.mubr.msk.f32.mxu1 %vm3956_vm0, %v3955_v1 }
 0x305   :  { %3567 = vmatprep.subr.bf16.mxu1 %v3960_v10 }
 0x308   :  { %3569 = vmatpush3.bf16.msra.mxu1 %v4111_v13 }
 0x309   :  { %3576 = vmatprep.subr.bf16.mxu1 %v3960_v10 }
 0x36b   :  { %v4164_v35 = vpop.permute.xlu0 %773 }
 0x36c   :  { %3296 = vmatmul.mubr.msk.f32.vlgmr.msra.gmra.mrb[0].mxu1 %vm673_vm3, %v4164_v35 }
 0x36d   :  { %3578 = vmatpush3.bf16.msra.mxu1 %v4100_v9  ;;  %3317 = vmatprep.mubr.msk.f32.mxu1 %vm3956_vm0, %v3955_v1 }
 0x36e   :  { %3579 = vmatprep.subr.bf16.mxu1 %v3960_v10 }
 0x371   :  { %3581 = vmatpush3.bf16.msra.mxu1 %v4111_v13 }
 0x372   :  { %3588 = vmatprep.subr.bf16.mxu1 %v3960_v10 }
 0x43f   :  { %v843_v36 = vpop.f32.mrb[0].mxu1 }
 0x440   :  { %v3712_v37 = vadd.f32 %v4128_v14, %v843_v36  ;;  %v3297_v38 = vpop.f32.mrb[1].mxu1 }
 0x442   :  { %3781 = vtanh.f32 %v3712_v37  ;;  %v3050_v40 = vmul.f32 -1.442695, %v3712_v37 }
 0x444   :  { %3783 = vpow2.f32 %v3050_v40 }
 0x44c   :  { %v3782_v39 = vpop.eup %3781 }
 0x44d   :  { %857 = vrot.lane.b32.xlu1 %v3782_v39, %s3961_s15 }
 0x44e   :  { %v3784_v41 = vpop.eup %3783 }
 0x44f   :  { %v851_v42 = vadd.f32 1.0, %v3784_v41 }
 0x451   :  { %3785 = vrcp.f32 %v851_v42 }
 0x45b   :  { %v3786_v43 = vpop.eup %3785 }
 0x45c   :  { %v855_v46 = vmul.f32 %v3786_v43, %v765_v27 }
 0x4bf   :  { %v858_v44 = vpop.permute.xlu1 %857 }
 0x4c0   :  { %v860_v45 = vmul.f32 %v3786_v43, %v858_v44 }
 0x4c2   :  { %862 = vrot.lane.b32.xlu0 %v860_v45, %s3962_s16 }
 0x534   :  { %v863_v47 = vpop.permute.xlu0 %862 }
 0x535   :  { %v865_v48 = vadd.f32 %v863_v47, %v855_v46 }
 0x537   :  { %3787 = vtanh.f32 %v865_v48 }
 0x541   :  { %v3788_v49 = vpop.eup %3787 }
 0x542   :  { %868 = vrot.lane.b32.xlu1 %v3788_v49, %s3961_s15 }
 0x5b4   :  { %v869_v50 = vpop.permute.xlu1 %868 }
 0x5b5   :  { %v871_v51 = vmul.f32 %v3786_v43, %v869_v50 }
 0x5b7   :  { %873 = vrot.lane.b32.xlu0 %v871_v51, %s3962_s16 }
 0x629   :  { %v4179_v52 = vpop.permute.xlu0 %873 }
 0x62a   :  { %3307 = vmatmul.mubr.msk.f32.vlgmr.msra.gmra.mrb[2].mxu0 %vm673_vm3, %v4179_v52 }
 0x62b   :  { %3584 = vmatpush3.bf16.msra.mxu0 %v4100_v9  ;;  %3328 = vmatprep.mubr.msk.f32.mxu0 %vm3956_vm0, %v3955_v1 }
 0x62c   :  { %3585 = vmatprep.subr.bf16.mxu0 %v3960_v10 }
 0x62f   :  { %3587 = vmatpush3.bf16.msra.mxu0 %v4111_v13 }
 0x630   :  { %3594 = vmatprep.subr.bf16.mxu0 %v3960_v10 }
 0x6fd   :  { %v943_v53 = vpop.f32.mrb[2].mxu0 }
 0x6fe   :  { %v3713_v54 = vadd.f32 %v4128_v14, %v943_v53  ;;  %v3308_v55 = vpop.f32.mrb[3].mxu0 }
 0x700   :  { %3789 = vtanh.f32 %v3713_v54  ;;  %v3052_v57 = vmul.f32 -1.442695, %v3713_v54 }
 0x702   :  { %3791 = vpow2.f32 %v3052_v57 }
 0x70a   :  { %v3790_v56 = vpop.eup %3789 }
 0x70b   :  { %957 = vrot.lane.b32.xlu1 %v3790_v56, %s3961_s15 }
 0x70c   :  { %v3792_v58 = vpop.eup %3791 }
 0x70d   :  { %v951_v59 = vadd.f32 1.0, %v3792_v58 }
 0x70f   :  { %3793 = vrcp.f32 %v951_v59 }
 0x719   :  { %v3794_v60 = vpop.eup %3793 }
 0x71a   :  { %v955_v63 = vmul.f32 %v3794_v60, %v865_v48 }
 0x77d   :  { %v958_v61 = vpop.permute.xlu1 %957 }
 0x77e   :  { %v960_v62 = vmul.f32 %v3794_v60, %v958_v61  ;;  %v1472_v61 = vld [vmem:[%s4480_s4] sm:$0xff] }
 0x780   :  { %962 = vrot.lane.b32.xlu0 %v960_v62, %s3962_s16  ;;  %v1473_v62 = vld [vmem:[%s4480_s4 + $0x8] sm:$0xff] }
 0x7f2   :  { %v963_v0 = vpop.permute.xlu0 %962 }
 0x7f3   :  { %v965_v2 = vadd.f32 %v963_v0, %v955_v63  ;;  %v4242_v63 = vpack.c.bf16 %v1473_v62, %v1472_v61  ;;  %v1474_v0 = vld [vmem:[%s4480_s4 + $0x10] sm:$0xff] }
 0x7f5   :  { %3795 = vtanh.f32 %v965_v2 }
 0x7ff   :  { %v3796_v3 = vpop.eup %3795 }
 0x800   :  { %968 = vrot.lane.b32.xlu1 %v3796_v3, %s3961_s15 }
 0x872   :  { %v969_v4 = vpop.permute.xlu1 %968 }
 0x873   :  { %v971_v5 = vmul.f32 %v3794_v60, %v969_v4 }
 0x875   :  { %973 = vrot.lane.b32.xlu0 %v971_v5, %s3962_s16 }
 0x8e7   :  { %v4194_v6 = vpop.permute.xlu0 %973 }
 0x8e8   :  { %3318 = vmatmul.mubr.msk.f32.vlgmr.msra.gmra.mrb[2].mxu1 %vm673_vm3, %v4194_v6 }
 0x8e9   :  { %3590 = vmatpush3.bf16.msra.mxu1 %v4100_v9  ;;  %3339 = vmatprep.mubr.msk.f32.mxu1 %vm3956_vm0, %v3955_v1 }
 0x8ea   :  { %3591 = vmatprep.subr.bf16.mxu1 %v3960_v10 }
 0x8ed   :  { %3593 = vmatpush3.bf16.msra.mxu1 %v4111_v13 }
 0x8ee   :  { %3600 = vmatprep.subr.bf16.mxu1 %v3960_v10 }
 0x9bb   :  { %v1043_v7 = vpop.f32.mrb[2].mxu1 }
 0x9bc   :  { %v3714_v8 = vadd.f32 %v4128_v14, %v1043_v7  ;;  %v3319_v11 = vpop.f32.mrb[3].mxu1 }
 0x9be   :  { %3797 = vtanh.f32 %v3714_v8  ;;  %v3054_v15 = vmul.f32 -1.442695, %v3714_v8 }
 0x9c0   :  { %3799 = vpow2.f32 %v3054_v15 }
 0x9c8   :  { %v3798_v12 = vpop.eup %3797 }
 0x9c9   :  { %1057 = vrot.lane.b32.xlu1 %v3798_v12, %s3961_s15 }
 0x9ca   :  { %v3800_v16 = vpop.eup %3799 }
 0x9cb   :  { %v1051_v17 = vadd.f32 1.0, %v3800_v16 }
 0x9cd   :  { %3801 = vrcp.f32 %v1051_v17 }
 0x9d7   :  { %v3802_v18 = vpop.eup %3801 }
 0x9d8   :  { %v1055_v21 = vmul.f32 %v3802_v18, %v965_v2  ;;  %v1475_v2 = vld [vmem:[%s4480_s4 + $0x18] sm:$0xff] }
 0x9d9   :  { %v4255_v4 = vpack.c.bf16 %v1475_v2, %v1474_v0 }
 0xa3b   :  { %v1058_v19 = vpop.permute.xlu1 %1057 }
 0xa3c   :  { %v1060_v20 = vmul.f32 %v3802_v18, %v1058_v19 }
 0xa3e   :  { %1062 = vrot.lane.b32.xlu0 %v1060_v20, %s3962_s16 }
 0xab0   :  { %v1063_v22 = vpop.permute.xlu0 %1062 }
 0xab1   :  { %v1065_v23 = vadd.f32 %v1063_v22, %v1055_v21 }
 0xab3   :  { %3803 = vtanh.f32 %v1065_v23 }
 0xabd   :  { %v3804_v24 = vpop.eup %3803 }
 0xabe   :  { %1068 = vrot.lane.b32.xlu1 %v3804_v24, %s3961_s15  ;;  %v1476_v24 = vld [vmem:[%s4481_s5] sm:$0xff] }
 0xb30   :  { %v1069_v25 = vpop.permute.xlu1 %1068 }
 0xb31   :  { %v1071_v26 = vmul.f32 %v3802_v18, %v1069_v25  ;;  %v1477_v25 = vld [vmem:[%s4481_s5 + $0x8] sm:$0xff] }
 0xb33   :  { %1073 = vrot.lane.b32.xlu0 %v1071_v26, %s3962_s16  ;;  %v4299_v26 = vpack.c.bf16 %v1477_v25, %v1476_v24 }
 0xba5   :  { %v4209_v27 = vpop.permute.xlu0 %1073 }
 0xba6   :  { %3329 = vmatmul.mubr.msk.f32.vlgmr.msra.gmra.mrb[4].mxu0 %vm673_vm3, %v4209_v27 }
 0xba7   :  { %3596 = vmatpush3.bf16.msra.mxu0 %v4100_v9  ;;  %3350 = vmatprep.mubr.msk.f32.mxu0 %vm3956_vm0, %v3955_v1 }
 0xba8   :  { %3597 = vmatprep.subr.bf16.mxu0 %v3960_v10 }
 0xbab   :  { %3599 = vmatpush3.bf16.msra.mxu0 %v4111_v13 }
 0xbac   :  { %3606 = vmatprep.subr.bf16.mxu0 %v3960_v10 }
 0xc79   :  { %v1143_v28 = vpop.f32.mrb[4].mxu0 }
 0xc7a   :  { %v3715_v29 = vadd.f32 %v4128_v14, %v1143_v28  ;;  %v3330_v30 = vpop.f32.mrb[5].mxu0  ;;  %v1478_v28 = vld [vmem:[%s4481_s5 + $0x10] sm:$0xff] }
 0xc7c   :  { %3805 = vtanh.f32 %v3715_v29  ;;  %v3056_v32 = vmul.f32 -1.442695, %v3715_v29  ;;  %v1479_v29 = vld [vmem:[%s4481_s5 + $0x18] sm:$0xff] }
 0xc7e   :  { %3807 = vpow2.f32 %v3056_v32 }
 0xc86   :  { %v3806_v31 = vpop.eup %3805 }
 0xc87   :  { %1157 = vrot.lane.b32.xlu1 %v3806_v31, %s3961_s15  ;;  %v4311_v31 = vpack.c.bf16 %v1479_v29, %v1478_v28 }
 0xc88   :  { %v3808_v33 = vpop.eup %3807 }
 0xc89   :  { %v1151_v34 = vadd.f32 1.0, %v3808_v33  ;;  %v4358_v33 = vld [vmem:[%s4482_s6] ss:$0 sm:$0xff] }
 0xc8b   :  { %3809 = vrcp.f32 %v1151_v34 }
 0xc95   :  { %v3810_v36 = vpop.eup %3809 }
 0xc96   :  { %v1155_v39 = vmul.f32 %v3810_v36, %v1065_v23 }
 0xcf9   :  { %v1158_v37 = vpop.permute.xlu1 %1157 }
 0xcfa   :  { %v1160_v38 = vmul.f32 %v3810_v36, %v1158_v37 }
 0xcfc   :  { %1162 = vrot.lane.b32.xlu0 %v1160_v38, %s3962_s16 }
 0xd6e   :  { %v1163_v40 = vpop.permute.xlu0 %1162 }
 0xd6f   :  { %v1165_v41 = vadd.f32 %v1163_v40, %v1155_v39 }
 0xd71   :  { %3811 = vtanh.f32 %v1165_v41 }
 0xd7b   :  { %v3812_v42 = vpop.eup %3811 }
 0xd7c   :  { %1168 = vrot.lane.b32.xlu1 %v3812_v42, %s3961_s15 }
 0xdee   :  { %v1169_v43 = vpop.permute.xlu1 %1168 }
 0xdef   :  { %v1171_v44 = vmul.f32 %v3810_v36, %v1169_v43 }
 0xdf1   :  { %1173 = vrot.lane.b32.xlu0 %v1171_v44, %s3962_s16 }
 0xe63   :  { %v1174_v45 = vpop.permute.xlu0 %1173 }
 0xe64   :  { %3340 = vmatmul.mubr.msk.f32.vlgmr.msra.gmra.mrb[4].mxu1 %vm673_vm3, %v1174_v45 }
 0xe65   :  { %3602 = vmatpush3.bf16.msra.mxu1 %v4100_v9  ;;  %3361 = vmatprep.mubr.msk.f32.mxu1 %vm3956_vm0, %v3955_v1 }
 0xe66   :  { %3603 = vmatprep.subr.bf16.mxu1 %v3960_v10 }
 0xe69   :  { %3605 = vmatpush3.bf16.msra.mxu1 %v4111_v13 }
 0xe6a   :  { %3612 = vmatprep.subr.bf16.mxu1 %v3960_v10 }
 0xf37   :  { %v1243_v46 = vpop.f32.mrb[4].mxu1 }
 0xf38   :  { %v3716_v47 = vadd.f32 %v4128_v14, %v1243_v46  ;;  %v3341_v48 = vpop.f32.mrb[5].mxu1 }
 0xf3a   :  { %3813 = vtanh.f32 %v3716_v47  ;;  %v3058_v50 = vmul.f32 -1.442695, %v3716_v47 }
 0xf3c   :  { %3815 = vpow2.f32 %v3058_v50 }
 0xf44   :  { %v3814_v49 = vpop.eup %3813 }
 0xf45   :  { %1257 = vrot.lane.b32.xlu1 %v3814_v49, %s3961_s15 }
 0xf46   :  { %v3816_v9 = vpop.eup %3815 }
 0xf47   :  { %v1251_v51 = vadd.f32 1.0, %v3816_v9 }
 0xf49   :  { %3817 = vrcp.f32 %v1251_v51 }
 0xf53   :  { %v3818_v53 = vpop.eup %3817 }
 0xf54   :  { %v1255_v13 = vmul.f32 %v3818_v53, %v1165_v41 }
 0xfb7   :  { %v1258_v54 = vpop.permute.xlu1 %1257 }
 0xfb8   :  { %v1260_v55 = vmul.f32 %v3818_v53, %v1258_v54 }
 0xfba   :  { %1262 = vrot.lane.b32.xlu0 %v1260_v55, %s3962_s16 }
0x102c   :  { %v1263_v56 = vpop.permute.xlu0 %1262 }
0x102d   :  { %v1265_v57 = vadd.f32 %v1263_v56, %v1255_v13 }
0x102f   :  { %3819 = vtanh.f32 %v1265_v57 }
0x1039   :  { %v3820_v58 = vpop.eup %3819 }
0x103a   :  { %1268 = vrot.lane.b32.xlu1 %v3820_v58, %s3961_s15 }
0x10ac   :  { %v1269_v59 = vpop.permute.xlu1 %1268 }
0x10ad   :  { %v1271_v60 = vmul.f32 %v3818_v53, %v1269_v59 }
0x10af   :  { %1273 = vrot.lane.b32.xlu0 %v1271_v60, %s3962_s16 }
0x1121   :  { %v4250_v3 = vpop.permute.xlu0 %1273 }
0x1122   :  { %3351 = vmatmul.mubr.msk.f32.vlgmr.msra.gmra.mrb[6].mxu0 %vm673_vm3, %v4250_v3 }
0x1123   :  { %3608 = vmatpush3.bf16.msra.mxu0 %v4242_v63  ;;  %3372 = vmatprep.mubr.msk.f32.mxu0 %vm3956_vm0, %v3955_v1 }
0x1124   :  { %3609 = vmatprep.subr.bf16.mxu0 %v3960_v10 }
0x1127   :  { %3611 = vmatpush3.bf16.msra.mxu0 %v4255_v4 }
0x1128   :  { %3618 = vmatprep.subr.bf16.mxu0 %v3960_v10 }
0x112a   :  { %3373 = vmatmul.mubr.msk.f32.vlgmr.msra.gmra.mrb[8].mxu0 %vm673_vm3, %v4164_v35 }
0x112b   :  { %3620 = vmatpush3.bf16.msra.mxu0 %v4242_v63  ;;  %3394 = vmatprep.mubr.msk.f32.mxu0 %vm3956_vm0, %v3955_v1 }
0x112c   :  { %3621 = vmatprep.subr.bf16.mxu0 %v3960_v10 }
0x112f   :  { %3623 = vmatpush3.bf16.msra.mxu0 %v4255_v4 }
0x1130   :  { %3630 = vmatprep.subr.bf16.mxu0 %v3960_v10 }
0x1132   :  { %3395 = vmatmul.mubr.msk.f32.vlgmr.msra.gmra.mrb[10].mxu0 %vm673_vm3, %v4194_v6 }
0x1133   :  { %3632 = vmatpush3.bf16.msra.mxu0 %v4242_v63  ;;  %3416 = vmatprep.mubr.msk.f32.mxu0 %vm3956_vm0, %v3955_v1 }
0x1134   :  { %3633 = vmatprep.subr.bf16.mxu0 %v3960_v10 }
0x1137   :  { %3635 = vmatpush3.bf16.msra.mxu0 %v4255_v4 }
0x1138   :  { %3642 = vmatprep.subr.bf16.mxu0 %v3960_v10 }
0x113a   :  { %3417 = vmatmul.mubr.msk.f32.vlgmr.msra.gmra.mrb[12].mxu0 %vm673_vm3, %v1174_v45 }
0x113b   :  { %3644 = vmatpush3.bf16.msra.mxu0 %v4242_v63  ;;  %3438 = vmatprep.mubr.msk.f32.mxu0 %vm3956_vm0, %v3955_v1 }
0x113c   :  { %3645 = vmatprep.subr.bf16.mxu0 %v3960_v10 }
0x113f   :  { %3647 = vmatpush3.bf16.msra.mxu0 %v4255_v4 }
0x1140   :  { %3654 = vmatprep.subr.bf16.mxu0 %v3960_v10 }
0x11f5   :  { %v1343_v35 = vpop.f32.mrb[6].mxu0 }
0x11f6   :  { %v3717_v5 = vadd.f32 %v4128_v14, %v1343_v35  ;;  %v3352_v6 = vpop.f32.mrb[7].mxu0 }
0x11f8   :  { %3821 = vtanh.f32 %v3717_v5  ;;  %v3060_v8 = vmul.f32 -1.442695, %v3717_v5 }
0x11fa   :  { %3823 = vpow2.f32 %v3060_v8 }
0x1202   :  { %v3822_v7 = vpop.eup %3821 }
0x1203   :  { %1357 = vrot.lane.b32.xlu1 %v3822_v7, %s3961_s15 }
0x1204   :  { %v3824_v11 = vpop.eup %3823 }
0x1205   :  { %v1351_v12 = vadd.f32 1.0, %v3824_v11 }
0x1207   :  { %3825 = vrcp.f32 %v1351_v12 }
0x1211   :  { %v3826_v15 = vpop.eup %3825 }
0x1212   :  { %v1355_v18 = vmul.f32 %v3826_v15, %v1265_v57 }
0x1275   :  { %v1358_v16 = vpop.permute.xlu1 %1357 }
0x1276   :  { %v1360_v17 = vmul.f32 %v3826_v15, %v1358_v16 }
0x1278   :  { %1362 = vrot.lane.b32.xlu0 %v1360_v17, %s3962_s16 }
0x12ea   :  { %v1363_v19 = vpop.permute.xlu0 %1362 }
0x12eb   :  { %v4288_v20 = vadd.f32 %v1363_v19, %v1355_v18 }
0x12ed   :  { %3827 = vtanh.f32 %v4288_v20 }
0x12f7   :  { %v3828_v21 = vpop.eup %3827 }
0x12f8   :  { %1368 = vrot.lane.b32.xlu1 %v3828_v21, %s3961_s15 }
0x136a   :  { %v1369_v22 = vpop.permute.xlu1 %1368 }
0x136b   :  { %v1371_v23 = vmul.f32 %v3826_v15, %v1369_v22 }
0x136d   :  { %1373 = vrot.lane.b32.xlu0 %v1371_v23, %s3962_s16 }
0x13df   :  { %v1374_v30 = vpop.permute.xlu0 %1373 }
0x13e0   :  { %3362 = vmatmul.mubr.msk.f32.vlgmr.msra.gmra.mrb[6].mxu1 %vm673_vm3, %v1374_v30  ;;  %3439 = vmatmul.mubr.msk.f32.vlgmr.msra.gmra.mrb[14].mxu0 %vm673_vm3, %v1374_v30 }
0x13e1   :  { %3614 = vmatpush3.bf16.msra.mxu1 %v4242_v63  ;;  %3656 = vmatpush3.bf16.msra.mxu0 %v4299_v26 }
0x13e2   :  { %3615 = vmatprep.subr.bf16.mxu1 %v3960_v10  ;;  %3657 = vmatprep.subr.bf16.mxu0 %v3960_v10 }
0x13e3   :  { %3383 = vmatprep.mubr.msk.f32.mxu1 %vm3956_vm0, %v3955_v1  ;;  %3460 = vmatprep.mubr.msk.f32.mxu0 %vm3956_vm0, %v3955_v1 }
0x13e5   :  { %3617 = vmatpush3.bf16.msra.mxu1 %v4255_v4  ;;  %3659 = vmatpush3.bf16.msra.mxu0 %v4311_v31 }
0x13e6   :  { %3624 = vmatprep.subr.bf16.mxu1 %v3960_v10  ;;  %3666 = vmatprep.subr.bf16.mxu0 %v3960_v10 }
0x13e8   :  { %3384 = vmatmul.mubr.msk.f32.vlgmr.msra.gmra.mrb[8].mxu1 %vm673_vm3, %v4179_v52  ;;  %3461 = vmatmul.mubr.f32.vlgmr.msra.gmra.mrb[8].mxu0 %v3955_v1 }
0x13e9   :  { %3626 = vmatpush3.bf16.msra.mxu1 %v4242_v63  ;;  %3405 = vmatprep.mubr.msk.f32.mxu1 %vm3956_vm0, %v3955_v1 }
0x13ea   :  { %3627 = vmatprep.subr.bf16.mxu1 %v3960_v10  ;;  %3668 = vmatpush3.bf16.msra.mxu0 %v4299_v26 }
0x13eb   :  { %3669 = vmatprep.subr.bf16.mxu0 %v3960_v10  ;;  %3482 = vmatprep.mubr.msk.f32.mxu0 %vm3956_vm0, %v3955_v1 }
0x13ed   :  { %3629 = vmatpush3.bf16.msra.mxu1 %v4255_v4 }
0x13ee   :  { %3636 = vmatprep.subr.bf16.mxu1 %v3960_v10  ;;  %3671 = vmatpush3.bf16.msra.mxu0 %v4311_v31 }
0x13ef   :  { %3678 = vmatprep.subr.bf16.mxu0 %v3960_v10 }
0x13f0   :  { %3406 = vmatmul.mubr.msk.f32.vlgmr.msra.gmra.mrb[10].mxu1 %vm673_vm3, %v4209_v27 }
0x13f1   :  { %3638 = vmatpush3.bf16.msra.mxu1 %v4242_v63  ;;  %3427 = vmatprep.mubr.msk.f32.mxu1 %vm3956_vm0, %v3955_v1 }
0x13f2   :  { %3639 = vmatprep.subr.bf16.mxu1 %v3960_v10 }
0x13f5   :  { %3641 = vmatpush3.bf16.msra.mxu1 %v4255_v4 }
0x13f6   :  { %3648 = vmatprep.subr.bf16.mxu1 %v3960_v10 }
0x13f8   :  { %3428 = vmatmul.mubr.msk.f32.vlgmr.msra.gmra.mrb[12].mxu1 %vm673_vm3, %v4250_v3 }
0x13f9   :  { %3650 = vmatpush3.bf16.msra.mxu1 %v4242_v63  ;;  %3449 = vmatprep.mubr.msk.f32.mxu1 %vm3956_vm0, %v3955_v1 }
0x13fa   :  { %3651 = vmatprep.subr.bf16.mxu1 %v3960_v10 }
0x13fd   :  { %3653 = vmatpush3.bf16.msra.mxu1 %v4255_v4 }
0x13fe   :  { %3660 = vmatprep.subr.bf16.mxu1 %v3960_v10 }
0x14b3   :  { %v1443_v52 = vpop.f32.mrb[6].mxu1 }
0x14b4   :  { %v3718_v27 = vadd.f32 %v4128_v14, %v1443_v52  ;;  %v3363_v32 = vpop.f32.mrb[7].mxu1 }
0x14b6   :  { %3829 = vtanh.f32 %v3718_v27  ;;  %v3062_v40 = vmul.f32 -1.442695, %v3718_v27 }
0x14bb   :  { %v2118_v34 = vpop.f32.mrb[8].mxu0 }
0x14bc   :  { %v3719_v36 = vadd.f32 %v4358_v33, %v2118_v34  ;;  %v3462_v37 = vpop.f32.mrb[9].mxu0 }
0x14be   :  { %3831 = vtanh.f32 %v3719_v36  ;;  %v3072_v14 = vmul.f32 -1.442695, %v3719_v36 }
0x14bf   :  { %3833 = vpow2.f32 %v3062_v40 }
0x14c0   :  { %v3830_v38 = vpop.eup %3829  ;;  %3835 = vpow2.f32 %v3072_v14 }
0x14c1   :  { %1457 = vrot.lane.b32.xlu1 %v3830_v38, %s3961_s15 }
0x14c8   :  { %v3832_v39 = vpop.eup %3831 }
0x14c9   :  { %2132 = vrot.lane.b32.xlu0 %v3832_v39, %s3961_s15  ;;  %v3834_v41 = vpop.eup %3833 }
0x14ca   :  { %v1451_v42 = vadd.f32 1.0, %v3834_v41  ;;  %v3836_v43 = vpop.eup %3835 }
0x14cb   :  { %v2126_v44 = vadd.f32 1.0, %v3836_v43 }
0x14cc   :  { %3837 = vrcp.f32 %v1451_v42 }
0x14cd   :  { %3839 = vrcp.f32 %v2126_v44 }
0x14d6   :  { %v3838_v45 = vpop.eup %3837 }
0x14d7   :  { %v3840_v48 = vpop.eup %3839  ;;  %v1455_v9 = vmul.f32 %v3838_v45, %v4288_v20 }
0x14d8   :  { %v2130_v54 = vmul.f32 0.0, %v3840_v48 }
0x1533   :  { %v1458_v46 = vpop.permute.xlu1 %1457 }
0x1534   :  { %v1460_v47 = vmul.f32 %v3838_v45, %v1458_v46 }
0x1536   :  { %1462 = vrot.lane.b32.xlu1 %v1460_v47, %s3962_s16 }
0x153b   :  { %v2133_v49 = vpop.permute.xlu0 %2132 }
0x153c   :  { %v2135_v50 = vmul.f32 %v3840_v48, %v2133_v49 }
0x153e   :  { %2137 = vrot.lane.b32.xlu0 %v2135_v50, %s3962_s16 }
0x15a8   :  { %v1463_v51 = vpop.permute.xlu1 %1462 }
0x15a9   :  { %v1465_v53 = vadd.f32 %v1463_v51, %v1455_v9 }
0x15ab   :  { %3841 = vtanh.f32 %v1465_v53 }
0x15b0   :  { %v2138_v55 = vpop.permute.xlu0 %2137 }
0x15b1   :  { %v2140_v13 = vadd.f32 %v2138_v55, %v2130_v54 }
0x15b3   :  { %3843 = vtanh.f32 %v2140_v13 }
0x15b5   :  { %v3842_v56 = vpop.eup %3841 }
0x15b6   :  { %1468 = vrot.lane.b32.xlu1 %v3842_v56, %s3961_s15 }
0x15bd   :  { %v3844_v57 = vpop.eup %3843 }
0x15be   :  { %2143 = vrot.lane.b32.xlu0 %v3844_v57, %s3961_s15 }
0x1628   :  { %v1469_v58 = vpop.permute.xlu1 %1468 }
0x1629   :  { %v1471_v59 = vmul.f32 %v3838_v45, %v1469_v58 }
0x162b   :  { %1978 = vrot.lane.b32.xlu1 %v1471_v59, %s3962_s16 }
0x1630   :  { %v2144_v60 = vpop.permute.xlu0 %2143 }
0x1631   :  { %v2146_v61 = vmul.f32 %v3840_v48, %v2144_v60 }
0x1633   :  { %2148 = vrot.lane.b32.xlu0 %v2146_v61, %s3962_s16 }
0x169d   :  { %v1979_v62 = vpop.permute.xlu1 %1978 }
0x169e   :  { %3450 = vmatmul.mubr.msk.f32.vlgmr.msra.gmra.mrb[14].mxu1 %vm673_vm3, %v1979_v62 }
0x169f   :  { %3662 = vmatpush3.bf16.msra.mxu1 %v4299_v26  ;;  %3471 = vmatprep.mubr.msk.f32.mxu1 %vm3956_vm0, %v3955_v1 }
0x16a0   :  { %3663 = vmatprep.subr.bf16.mxu1 %v3960_v10 }
0x16a3   :  { %3665 = vmatpush3.bf16.msra.mxu1 %v4311_v31 }
0x16a4   :  { %3672 = vmatprep.subr.bf16.mxu1 %v3960_v10 }
0x16a5   :  { %v2149_v63 = vpop.permute.xlu0 %2148 }
0x16a6   :  { %3472 = vmatmul.mubr.msk.f32.vlgmr.msra.gmra.mrb[8].mxu1 %vm673_vm3, %v2149_v63 }
0x16a7   :  { %3674 = vmatpush3.bf16.msra.mxu1 %v4299_v26  ;;  %3493 = vmatprep.mubr.msk.f32.mxu1 %vm3956_vm0, %v3955_v1 }
0x16a8   :  { %3675 = vmatprep.subr.bf16.mxu1 %v3960_v10 }
0x16ab   :  { %3677 = vmatpush3.bf16.msra.mxu1 %v4311_v31 }
0x16ac   :  { %3684 = vmatprep.subr.bf16.mxu1 %v3960_v10 }
0x1779   :  { %v2218_v0 = vpop.f32.mrb[8].mxu1 }
0x177a   :  { %v3720_v2 = vadd.f32 %v4358_v33, %v2218_v0  ;;  %v3473_v3 = vpop.f32.mrb[9].mxu1 }
0x177c   :  { %3845 = vtanh.f32 %v3720_v2  ;;  %v3074_v35 = vmul.f32 -1.442695, %v3720_v2 }
0x177e   :  { %3847 = vpow2.f32 %v3074_v35 }
0x1786   :  { %v3846_v4 = vpop.eup %3845 }
0x1787   :  { %2232 = vrot.lane.b32.xlu1 %v3846_v4, %s3961_s15 }
0x1788   :  { %v3848_v5 = vpop.eup %3847 }
0x1789   :  { %v2226_v6 = vadd.f32 1.0, %v3848_v5 }
0x178b   :  { %3849 = vrcp.f32 %v2226_v6 }
0x1795   :  { %v3850_v7 = vpop.eup %3849 }
0x1796   :  { %v2230_v12 = vmul.f32 %v3850_v7, %v2140_v13 }
0x17f9   :  { %v2233_v8 = vpop.permute.xlu1 %2232 }
0x17fa   :  { %v2235_v11 = vmul.f32 %v3850_v7, %v2233_v8 }
0x17fc   :  { %2237 = vrot.lane.b32.xlu0 %v2235_v11, %s3962_s16 }
0x186e   :  { %v2238_v15 = vpop.permute.xlu0 %2237 }
0x186f   :  { %v2240_v16 = vadd.f32 %v2238_v15, %v2230_v12 }
0x1871   :  { %3851 = vtanh.f32 %v2240_v16 }
0x187b   :  { %v3852_v17 = vpop.eup %3851 }
0x187c   :  { %2243 = vrot.lane.b32.xlu1 %v3852_v17, %s3961_s15 }
0x18ee   :  { %v2244_v18 = vpop.permute.xlu1 %2243 }
0x18ef   :  { %v2246_v19 = vmul.f32 %v3850_v7, %v2244_v18 }
0x18f1   :  { %2248 = vrot.lane.b32.xlu0 %v2246_v19, %s3962_s16 }
0x1963   :  { %v2249_v20 = vpop.permute.xlu0 %2248 }
0x1964   :  { %3483 = vmatmul.mubr.msk.f32.vlgmr.msra.gmra.mrb[10].mxu0 %vm673_vm3, %v2249_v20 }
0x1965   :  { %3680 = vmatpush3.bf16.msra.mxu0 %v4299_v26  ;;  %3504 = vmatprep.mubr.msk.f32.mxu0 %vm3956_vm0, %v3955_v1 }
0x1966   :  { %3681 = vmatprep.subr.bf16.mxu0 %v3960_v10 }
0x1969   :  { %3683 = vmatpush3.bf16.msra.mxu0 %v4311_v31 }
0x196a   :  { %3690 = vmatprep.subr.bf16.mxu0 %v3960_v10 }
0x1a37   :  { %v2318_v21 = vpop.f32.mrb[10].mxu0 }
0x1a38   :  { %v3721_v22 = vadd.f32 %v4358_v33, %v2318_v21  ;;  %v3484_v23 = vpop.f32.mrb[11].mxu0 }
0x1a3a   :  { %3853 = vtanh.f32 %v3721_v22  ;;  %v3076_v25 = vmul.f32 -1.442695, %v3721_v22 }
0x1a3c   :  { %3855 = vpow2.f32 %v3076_v25 }
0x1a44   :  { %v3854_v24 = vpop.eup %3853 }
0x1a45   :  { %2332 = vrot.lane.b32.xlu1 %v3854_v24, %s3961_s15 }
0x1a46   :  { %v3856_v28 = vpop.eup %3855 }
0x1a47   :  { %v2326_v29 = vadd.f32 1.0, %v3856_v28 }
0x1a49   :  { %3857 = vrcp.f32 %v2326_v29 }
0x1a53   :  { %v3858_v30 = vpop.eup %3857 }
0x1a54   :  { %v2330_v32 = vmul.f32 %v3858_v30, %v2240_v16 }
0x1ab7   :  { %v2333_v52 = vpop.permute.xlu1 %2332 }
0x1ab8   :  { %v2335_v27 = vmul.f32 %v3858_v30, %v2333_v52 }
0x1aba   :  { %2337 = vrot.lane.b32.xlu0 %v2335_v27, %s3962_s16 }
0x1b2c   :  { %v2338_v34 = vpop.permute.xlu0 %2337 }
0x1b2d   :  { %v2340_v36 = vadd.f32 %v2338_v34, %v2330_v32 }
0x1b2f   :  { %3859 = vtanh.f32 %v2340_v36 }
0x1b39   :  { %v3860_v37 = vpop.eup %3859 }
0x1b3a   :  { %2343 = vrot.lane.b32.xlu1 %v3860_v37, %s3961_s15 }
0x1bac   :  { %v2344_v38 = vpop.permute.xlu1 %2343 }
0x1bad   :  { %v2346_v39 = vmul.f32 %v3858_v30, %v2344_v38 }
0x1baf   :  { %2348 = vrot.lane.b32.xlu0 %v2346_v39, %s3962_s16 }
0x1c21   :  { %v2349_v40 = vpop.permute.xlu0 %2348 }
0x1c22   :  { %3494 = vmatmul.mubr.msk.f32.vlgmr.msra.gmra.mrb[10].mxu1 %vm673_vm3, %v2349_v40 }
0x1c23   :  { %3686 = vmatpush3.bf16.msra.mxu1 %v4299_v26  ;;  %3515 = vmatprep.mubr.msk.f32.mxu1 %vm3956_vm0, %v3955_v1 }
0x1c24   :  { %3687 = vmatprep.subr.bf16.mxu1 %v3960_v10 }
0x1c27   :  { %3689 = vmatpush3.bf16.msra.mxu1 %v4311_v31 }
0x1c28   :  { %3696 = vmatprep.subr.bf16.mxu1 %v3960_v10 }
0x1cf5   :  { %v2418_v14 = vpop.f32.mrb[10].mxu1 }
0x1cf6   :  { %v3722_v41 = vadd.f32 %v4358_v33, %v2418_v14  ;;  %v3495_v42 = vpop.f32.mrb[11].mxu1 }
0x1cf8   :  { %3861 = vtanh.f32 %v3722_v41  ;;  %v3078_v44 = vmul.f32 -1.442695, %v3722_v41 }
0x1cfa   :  { %3863 = vpow2.f32 %v3078_v44 }
0x1d02   :  { %v3862_v43 = vpop.eup %3861 }
0x1d03   :  { %2432 = vrot.lane.b32.xlu1 %v3862_v43, %s3961_s15 }
0x1d04   :  { %v3864_v45 = vpop.eup %3863 }
0x1d05   :  { %v2426_v46 = vadd.f32 1.0, %v3864_v45 }
0x1d07   :  { %3865 = vrcp.f32 %v2426_v46 }
0x1d11   :  { %v3866_v47 = vpop.eup %3865 }
0x1d12   :  { %v2430_v50 = vmul.f32 %v3866_v47, %v2340_v36 }
0x1d75   :  { %v2433_v48 = vpop.permute.xlu1 %2432 }
0x1d76   :  { %v2435_v49 = vmul.f32 %v3866_v47, %v2433_v48 }
0x1d78   :  { %2437 = vrot.lane.b32.xlu0 %v2435_v49, %s3962_s16 }
0x1dea   :  { %v2438_v9 = vpop.permute.xlu0 %2437 }
0x1deb   :  { %v2440_v51 = vadd.f32 %v2438_v9, %v2430_v50 }
0x1ded   :  { %3867 = vtanh.f32 %v2440_v51 }
0x1df7   :  { %v3868_v53 = vpop.eup %3867 }
0x1df8   :  { %2443 = vrot.lane.b32.xlu1 %v3868_v53, %s3961_s15 }
0x1e6a   :  { %v2444_v54 = vpop.permute.xlu1 %2443 }
0x1e6b   :  { %v2446_v55 = vmul.f32 %v3866_v47, %v2444_v54 }
0x1e6d   :  { %2448 = vrot.lane.b32.xlu0 %v2446_v55, %s3962_s16 }
0x1edf   :  { %v2449_v13 = vpop.permute.xlu0 %2448 }
0x1ee0   :  { %3505 = vmatmul.mubr.msk.f32.vlgmr.msra.gmra.mrb[12].mxu0 %vm673_vm3, %v2449_v13 }
0x1ee1   :  { %3692 = vmatpush3.bf16.msra.mxu0 %v4299_v26  ;;  %3526 = vmatprep.mubr.msk.f32.mxu0 %vm3956_vm0, %v3955_v1 }
0x1ee2   :  { %3693 = vmatprep.subr.bf16.mxu0 %v3960_v10 }
0x1ee5   :  { %3695 = vmatpush3.bf16.msra.mxu0 %v4311_v31 }
0x1ee6   :  { %3702 = vmatprep.subr.bf16.mxu0 %v3960_v10 }
0x1fb3   :  { %v2518_v56 = vpop.f32.mrb[12].mxu0 }
0x1fb4   :  { %v3723_v57 = vadd.f32 %v4358_v33, %v2518_v56  ;;  %v3506_v58 = vpop.f32.mrb[13].mxu0 }
0x1fb5   :  { %v2848_v58 = vld [vmem:[%s4483_s7 + $0x8] sm:$0xff] }
0x1fb6   :  { %3869 = vtanh.f32 %v3723_v57  ;;  %v3080_v60 = vmul.f32 -1.442695, %v3723_v57 }
0x1fb8   :  { %3871 = vpow2.f32 %v3080_v60 }
0x1fc0   :  { %v3870_v59 = vpop.eup %3869 }
0x1fc1   :  { %2532 = vrot.lane.b32.xlu1 %v3870_v59, %s3961_s15  ;;  %v2849_v59 = vld [vmem:[%s4483_s7 + $0x10] sm:$0xff] }
0x1fc2   :  { %v3872_v61 = vpop.eup %3871 }
0x1fc3   :  { %v2526_v62 = vadd.f32 1.0, %v3872_v61  ;;  %v2850_v61 = vld [vmem:[%s4483_s7 + $0x18] sm:$0xff] }
0x1fc5   :  { %3873 = vrcp.f32 %v2526_v62  ;;  %v3706_v62 = vpack.c.bf16 %v2850_v61, %v2849_v59 }
0x1fcf   :  { %v3874_v63 = vpop.eup %3873 }
0x1fd0   :  { %v2530_v3 = vmul.f32 %v3874_v63, %v2440_v51 }
0x2033   :  { %v2533_v0 = vpop.permute.xlu1 %2532 }
0x2034   :  { %v2535_v2 = vmul.f32 %v3874_v63, %v2533_v0 }
0x2036   :  { %2537 = vrot.lane.b32.xlu0 %v2535_v2, %s3962_s16 }
0x20a8   :  { %v2538_v4 = vpop.permute.xlu0 %2537 }
0x20a9   :  { %v2540_v35 = vadd.f32 %v2538_v4, %v2530_v3  ;;  %v2934_v4 = vld [vmem:[%s4485_s9] sm:$0xff] }
0x20ab   :  { %3875 = vtanh.f32 %v2540_v35 }
0x20b5   :  { %v3876_v5 = vpop.eup %3875 }
0x20b6   :  { %2543 = vrot.lane.b32.xlu1 %v3876_v5, %s3961_s15  ;;  %v3087_v5 = vld [vmem:[#allocation5] ss:$0 sm:$0xff] }
0x2128   :  { %v2544_v6 = vpop.permute.xlu1 %2543 }
0x2129   :  { %v2546_v7 = vmul.f32 %v3874_v63, %v2544_v6 }
0x212b   :  { %2548 = vrot.lane.b32.xlu0 %v2546_v7, %s3962_s16 }
0x219d   :  { %v2549_v8 = vpop.permute.xlu0 %2548 }
0x219e   :  { %3516 = vmatmul.mubr.msk.f32.vlgmr.msra.gmra.mrb[12].mxu1 %vm673_vm3, %v2549_v8 }
0x219f   :  { %3698 = vmatpush3.bf16.msra.mxu1 %v4299_v26  ;;  %3537 = vmatprep.mubr.msk.f32.mxu1 %vm3956_vm0, %v3955_v1 }
0x21a0   :  { %3699 = vmatprep.subr.bf16.mxu1 %v3960_v10 }
0x21a3   :  { %3701 = vmatpush3.bf16.msra.mxu1 %v4311_v31 }
0x21a4   :  { %3708 = vmatprep.subr.bf16.mxu1 %v3960_v10 }
0x2271   :  { %v2618_v11 = vpop.f32.mrb[12].mxu1 }
0x2272   :  { %v3724_v12 = vadd.f32 %v4358_v33, %v2618_v11  ;;  %v3517_v15 = vpop.f32.mrb[13].mxu1 }
0x2274   :  { %3877 = vtanh.f32 %v3724_v12  ;;  %v3082_v17 = vmul.f32 -1.442695, %v3724_v12  ;;  %v3089_v12 = vld [vmem:[#allocation2] ss:$0 sm:$0xff] }
0x2276   :  { %3879 = vpow2.f32 %v3082_v17 }
0x227e   :  { %v3878_v16 = vpop.eup %3877 }
0x227f   :  { %2632 = vrot.lane.b32.xlu1 %v3878_v16, %s3961_s15 }
0x2280   :  { %v3880_v26 = vpop.eup %3879 }
0x2281   :  { %v2626_v18 = vadd.f32 1.0, %v3880_v26 }
0x2283   :  { %3881 = vrcp.f32 %v2626_v18 }
0x228d   :  { %v3882_v19 = vpop.eup %3881 }
0x228e   :  { %v2630_v31 = vmul.f32 %v3882_v19, %v2540_v35  ;;  %v2935_v35 = vld [vmem:[%s4485_s9 + $0x8] sm:$0xff] }
0x22f1   :  { %v2633_v20 = vpop.permute.xlu1 %2632 }
0x22f2   :  { %v2635_v21 = vmul.f32 %v3882_v19, %v2633_v20 }
0x22f4   :  { %2637 = vrot.lane.b32.xlu0 %v2635_v21, %s3962_s16 }
0x2366   :  { %v2638_v22 = vpop.permute.xlu0 %2637 }
0x2367   :  { %v2640_v23 = vadd.f32 %v2638_v22, %v2630_v31 }
0x2369   :  { %3883 = vtanh.f32 %v2640_v23 }
0x2373   :  { %v3884_v24 = vpop.eup %3883 }
0x2374   :  { %2643 = vrot.lane.b32.xlu1 %v3884_v24, %s3961_s15 }
0x23e6   :  { %v2644_v25 = vpop.permute.xlu1 %2643 }
0x23e7   :  { %v2646_v28 = vmul.f32 %v3882_v19, %v2644_v25 }
0x23e9   :  { %2648 = vrot.lane.b32.xlu0 %v2646_v28, %s3962_s16 }
0x245b   :  { %v2649_v29 = vpop.permute.xlu0 %2648 }
0x245c   :  { %3527 = vmatmul.mubr.msk.f32.vlgmr.msra.gmra.mrb[14].mxu0 %vm673_vm3, %v2649_v29 }
0x245d   :  { %3548 = vmatprep.mubr.msk.f32.mxu0 %vm3956_vm0, %v3955_v1 }
0x252f   :  { %v2718_v30 = vpop.f32.mrb[14].mxu0 }
0x2530   :  { %v3725_v52 = vadd.f32 %v4358_v33, %v2718_v30  ;;  %v3528_v27 = vpop.f32.mrb[15].mxu0 }
0x2532   :  { %3885 = vtanh.f32 %v3725_v52  ;;  %v3084_v34 = vmul.f32 -1.442695, %v3725_v52 }
0x2534   :  { %3887 = vpow2.f32 %v3084_v34 }
0x253c   :  { %v3886_v32 = vpop.eup %3885 }
0x253d   :  { %2732 = vrot.lane.b32.xlu1 %v3886_v32, %s3961_s15 }
0x253e   :  { %v3888_v36 = vpop.eup %3887 }
0x253f   :  { %v2726_v37 = vadd.f32 1.0, %v3888_v36 }
0x2541   :  { %3889 = vrcp.f32 %v2726_v37 }
0x254b   :  { %v3890_v38 = vpop.eup %3889 }
0x254c   :  { %v2730_v14 = vmul.f32 %v3890_v38, %v2640_v23 }
0x25af   :  { %v2733_v39 = vpop.permute.xlu1 %2732 }
0x25b0   :  { %v2735_v40 = vmul.f32 %v3890_v38, %v2733_v39 }
0x25b2   :  { %2737 = vrot.lane.b32.xlu0 %v2735_v40, %s3962_s16 }
0x2624   :  { %v2738_v41 = vpop.permute.xlu0 %2737 }
0x2625   :  { %v2740_v42 = vadd.f32 %v2738_v41, %v2730_v14 }
0x2627   :  { %3891 = vtanh.f32 %v2740_v42 }
0x2631   :  { %v3892_v43 = vpop.eup %3891 }
0x2632   :  { %2743 = vrot.lane.b32.xlu1 %v3892_v43, %s3961_s15 }
0x26a4   :  { %v2744_v44 = vpop.permute.xlu1 %2743 }
0x26a5   :  { %v2746_v45 = vmul.f32 %v3890_v38, %v2744_v44 }
0x26a7   :  { %2748 = vrot.lane.b32.xlu0 %v2746_v45, %s3962_s16 }
0x2719   :  { %v2749_v46 = vpop.permute.xlu0 %2748 }
0x271a   :  { %3538 = vmatmul.mubr.msk.f32.vlgmr.msra.gmra.mrb[14].mxu1 %vm673_vm3, %v2749_v46 }
0x271b   :  { %3555 = vmatprep.mubr.msk.f32.mxu1 %vm3956_vm0, %v3955_v1 }
0x27ed   :  { %v2818_v47 = vpop.f32.mrb[14].mxu1 }
0x27ee   :  { %v3726_v48 = vadd.f32 %v4358_v33, %v2818_v47  ;;  %v3539_v49 = vpop.f32.mrb[15].mxu1  ;;  %v2847_v33 = vld [vmem:[%s4483_s7] sm:$0xff] }
0x27ef   :  { %v3703_v60 = vpack.c.bf16 %v2848_v58, %v2847_v33 }
0x27f0   :  { %3893 = vtanh.f32 %v3726_v48  ;;  %v3086_v9 = vmul.f32 -1.442695, %v3726_v48 }
0x27f1   :  { %3704 = vmatpush3.bf16.msra.mxu0 %v3703_v60 }
0x27f2   :  { %3895 = vpow2.f32 %v3086_v9  ;;  %3705 = vmatprep.subr.bf16.mxu0 %v3960_v10  ;;  %v3709_v10 = vpack.c.bf16 %v2935_v35, %v2934_v4 }
0x27f4   :  { %3710 = vmatpush3.bf16.msra.mxu1 %v3709_v10 }
0x27f5   :  { %3707 = vmatpush3.bf16.msra.mxu0 %v3706_v62 }
0x27fa   :  { %v3894_v50 = vpop.eup %3893 }
0x27fb   :  { %2832 = vrot.lane.b32.xlu1 %v3894_v50, %s3961_s15 }
0x27fc   :  { %v3896_v51 = vpop.eup %3895 }
0x27fd   :  { %v2826_v53 = vadd.f32 1.0, %v3896_v51 }
0x27ff   :  { %3897 = vrcp.f32 %v2826_v53 }
0x2809   :  { %v3898_v54 = vpop.eup %3897 }
0x280a   :  { %v2830_v56 = vmul.f32 %v3898_v54, %v2740_v42 }
0x286d   :  { %v2833_v55 = vpop.permute.xlu1 %2832 }
0x286e   :  { %v2835_v13 = vmul.f32 %v3898_v54, %v2833_v55 }
0x2870   :  { %2837 = vrot.lane.b32.xlu0 %v2835_v13, %s3962_s16 }
0x28e2   :  { %v2838_v1 = vpop.permute.xlu0 %2837 }
0x28e3   :  { %v2840_v57 = vadd.f32 %v2838_v1, %v2830_v56 }
0x28e5   :  { %3899 = vtanh.f32 %v2840_v57 }
0x28ef   :  { %v3900_v63 = vpop.eup %3899 }
0x28f0   :  { %2843 = vrot.lane.b32.xlu1 %v3900_v63, %s3961_s15 }
0x2962   :  { %v2844_v0 = vpop.permute.xlu1 %2843 }
0x2963   :  { %v2846_v2 = vmul.f32 %v3898_v54, %v2844_v0 }
0x2965   :  { %2859 = vrot.lane.b32.xlu0 %v2846_v2, %s3962_s16 }
0x29d7   :  { %v2860_v3 = vpop.permute.xlu0 %2859 }
0x29d8   :  { %3549 = vmatmul.mubr.msk.f32.vlgmr.msra.gmra.mrb[16].mxu0 %vm673_vm3, %v2860_v3 }
0x2aab   :  { %v2929_v6 = vpop.f32.mrb[16].mxu0 }
0x2aac   :  { %v2930_v7 = vadd.f32 %v3087_v5, %v2929_v6  ;;  %v3550_v8 = vpop.f32.mrb[17].mxu0 }
0x2aae   :  { %v2933_v11 = vmax.f32 %v2930_v7, 0.0 }
0x2ab0   :  { %3556 = vmatmul.mubr.msk.f32.vlgmr.msra.gmra.mrb[16].mxu1 %vm2943_vm4, %v2933_v11 }
0x2b83   :  { %v3013_v15 = vpop.f32.mrb[16].mxu1 }
0x2b84   :  { %v3014_v16 = vadd.f32 %v3089_v12, %v3013_v15  ;;  %v3557_v17 = vpop.f32.mrb[17].mxu1 }
0x2b86   :  { %v3091_v26 = vmul.f32 -1.442695, %v3014_v16 }
0x2b88   :  { %3901 = vpow2.f32 %v3091_v26 }
0x2b92   :  { %v3902_v18 = vpop.eup %3901 }
0x2b93   :  { %v3020_v19 = vadd.f32 1.0, %v3902_v18 }
0x2b95   :  { %3903 = vrcp.f32 %v3020_v19 }
0x2b9f   :  { %v3904_v20 = vpop.eup %3903 }
0x2ba0   :  { %3024 = vst.msk [vmem:[%s4487_s11] sm:$0x3] %vm3023_vm5, %v3904_v20 }
0x2ba1   :  { %3029 = vsyncpa [#allocation4], 1 }
0x2ba2   :  { %3030 = vsyncpa [#allocation6], 1 }

</bundles_post_ra>
